<compile_context>
chip_gen: v7x
topology: tpu7x:2x2x1
jax: 0.10.0
libtpu: 0.0.40
codegen_flags: <defaults>
</compile_context>

<pallas_src>
import functools

import jax
import jax.numpy as jnp
from jax.experimental import pallas as pl
from jax.experimental.pallas import tpu as pltpu

_IN_RAW = 110          # 100 noise + 10 embedding
_IN_PAD = 128          # lane-aligned K for the first matmul (zero rows in w1)
_H1 = 256
_H2 = 512
_OUT = 28 * 28         # 784 -- written at natural width (full last dim)


def _round_up(x, m):
    return (x + m - 1) // m * m


def _leaky_relu(x, slope=0.2):
    return jnp.where(x > 0, x, slope * x)


def _bf16_epilogue_supported():
    """bf16 VPU/EUP exists on v6e and newer; v5e and older have no bf16 path."""
    try:
        kind = jax.devices()[0].device_kind.lower()
    except Exception:  # pragma: no cover - be conservative if query fails
        return False
    return not any(tag in kind for tag in ("v2", "v3", "v4", "v5"))


def _batch_tiling(batch):
    """Pick (tm, b_pad): big tiles, balanced split, >=2 grid steps for B>=512."""
    b16 = _round_up(batch, 16)
    if b16 < 512:
        tm = b16                                    # single tile
    else:
        n_tiles = max(2, -(-b16 // 1024))           # <=1024 rows/tile, >=2 steps
        tm = _round_up(-(-b16 // n_tiles), 16)      # balanced (no near-empty tail)
    b_pad = _round_up(b16, tm)
    return tm, b_pad


def generator_mlp_kernel(x_ref, w1_ref, b1_ref, w2_ref, b2_ref, w3_ref, b3_ref,
                         out_ref, *, bf16_epilogue):
    # x tile: (tm, 128) f32.  Weights are bf16 and VMEM-resident across the
    # whole grid; biases are f32 (1, N).  Matmuls run bf16 x bf16 -> f32 acc.
    # LeakyReLU runs in bf16 on v6e/v7x (the cast is needed for the next
    # matmul anyway), f32 on v5e.  Final tanh stays f32.
    x = x_ref[...].astype(jnp.bfloat16)

    h1 = jnp.dot(x, w1_ref[...], preferred_element_type=jnp.float32) + b1_ref[...]
    if bf16_epilogue:
        h1 = _leaky_relu(h1.astype(jnp.bfloat16))
    else:
        h1 = _leaky_relu(h1).astype(jnp.bfloat16)

    h2 = jnp.dot(h1, w2_ref[...], preferred_element_type=jnp.float32) + b2_ref[...]
    if bf16_epilogue:
        h2 = _leaky_relu(h2.astype(jnp.bfloat16))
    else:
        h2 = _leaky_relu(h2).astype(jnp.bfloat16)

    h3 = jnp.dot(h2, w3_ref[...], preferred_element_type=jnp.float32) + b3_ref[...]
    out_ref[...] = jnp.tanh(h3).astype(out_ref.dtype)


def generator_forward(noise, labels, params, bf16_epilogue=None):
    """noise: (B, 100) f32, labels: (B,) int32 -> (B, 1, 28, 28) f32."""
    if bf16_epilogue is None:
        bf16_epilogue = _bf16_epilogue_supported()

    emb = jnp.take(params["emb"], labels, axis=0)          # (B, 10) glue gather
    gen_input = jnp.concatenate([noise, emb], axis=1)       # (B, 110)

    B = gen_input.shape[0]
    # Lane-pad K: 110 -> 128 (matching zero rows live in w1).
    x = jnp.pad(gen_input, ((0, 0), (0, _IN_PAD - _IN_RAW)))

    tm, b_pad = _batch_tiling(B)
    if b_pad != B:
        x = jnp.pad(x, ((0, b_pad - B), (0, 0)))
    grid = (b_pad // tm,)

    resident = lambda i: (0, 0)   # weights/biases: same block every grid step
    single = pl.Buffered(1)       # grid-invariant -> no double-buffering needed
    in_specs = [
        pl.BlockSpec((tm, _IN_PAD), lambda i: (i, 0)),                    # x tile
        pl.BlockSpec((_IN_PAD, _H1), resident, pipeline_mode=single),     # w1 bf16
        pl.BlockSpec((1, _H1), resident, pipeline_mode=single),           # b1
        pl.BlockSpec((_H1, _H2), resident, pipeline_mode=single),         # w2 bf16
        pl.BlockSpec((1, _H2), resident, pipeline_mode=single),           # b2
        pl.BlockSpec((_H2, _OUT), resident, pipeline_mode=single),        # w3 bf16
        pl.BlockSpec((1, _OUT), resident, pipeline_mode=single),          # b3
    ]
    # Block last dim equals the full array dim (784), so this is legal; only
    # the trailing 16-lane group is a masked store.
    out_spec = pl.BlockSpec((tm, _OUT), lambda i: (i, 0))

    flops = 2 * b_pad * (_IN_PAD * _H1 + _H1 * _H2 + _H2 * _OUT)
    weight_bytes = 2 * (_IN_PAD * _H1 + _H1 * _H2 + _H2 * _OUT)   # bf16
    bias_bytes = 4 * (_H1 + _H2 + _OUT)
    act_bytes = 4 * b_pad * (_IN_PAD + _OUT)
    cost = pl.CostEstimate(
        flops=flops,
        transcendentals=b_pad * _OUT,
        bytes_accessed=weight_bytes + bias_bytes + act_bytes,
    )

    img_pad = pl.pallas_call(
        functools.partial(generator_mlp_kernel, bf16_epilogue=bf16_epilogue),
        out_shape=jax.ShapeDtypeStruct((b_pad, _OUT), jnp.float32),
        grid=grid,
        in_specs=in_specs,
        out_specs=out_spec,
        compiler_params=pltpu.CompilerParams(
            dimension_semantics=("parallel",)),
        cost_estimate=cost,
    )(x,
      params["w1"], params["b1"],
      params["w2"], params["b2"],
      params["w3"], params["b3"])

    # Row slice only when the batch was padded; no lane re-pack pass anymore.
    img_flat = img_pad if b_pad == B else img_pad[:B]
    return img_flat.reshape(B, 1, 28, 28)


def init_params(key):
    """Parameter init mirroring PyTorch default shapes.

    Linear weights are stored transposed to (in, out) and cast to bf16; the
    first weight is zero-row-padded 110 -> 128 in K.  Biases stay f32, shaped
    (1, out).  The last layer keeps its natural 784-wide output.
    """
    ks = jax.random.split(key, 7)

    def linear(kw, kb, fan_in, fan_out):
        bound = 1.0 / jnp.sqrt(float(fan_in))
        w = jax.random.uniform(kw, (fan_in, fan_out), jnp.float32, -bound, bound)
        b = jax.random.uniform(kb, (1, fan_out), jnp.float32, -bound, bound)
        return w, b

    emb = jax.random.normal(ks[0], (10, 10), jnp.float32)   # nn.Embedding N(0,1)
    w1, b1 = linear(ks[1], ks[2], _IN_RAW, _H1)
    w2, b2 = linear(ks[3], ks[4], _H1, _H2)
    w3, b3 = linear(ks[5], ks[6], _H2, _OUT)

    # Zero rows for the K lane-padding of the first matmul.
    w1 = jnp.pad(w1, ((0, _IN_PAD - _IN_RAW), (0, 0)))            # (128, 256)

    return {
        "emb": emb,
        "w1": w1.astype(jnp.bfloat16), "b1": b1,
        "w2": w2.astype(jnp.bfloat16), "b2": b2,
        "w3": w3.astype(jnp.bfloat16), "b3": b3,
    }


if __name__ == "__main__":
    key = jax.random.PRNGKey(0)
    k_params, k_noise, k_labels = jax.random.split(key, 3)

    params = init_params(k_params)

    B = 8
    noise = jax.random.normal(k_noise, (B, 100), jnp.float32)
    labels = jax.random.randint(k_labels, (B,), 0, 10, jnp.int32)

    fwd = jax.jit(functools.partial(generator_forward, params=params))
    img = fwd(noise, labels)
    jax.block_until_ready(img)

    assert img.shape == (B, 1, 28, 28), img.shape
    assert img.dtype == jnp.float32

    # Reference with matched numerics (bf16 matmul operands, f32 accumulation,
    # same epilogue precision as the kernel on this chip generation).
    bf16_epi = _bf16_epilogue_supported()
    emb = jnp.take(params["emb"], labels, axis=0)
    x = jnp.concatenate([noise, emb], axis=1)
    x = jnp.pad(x, ((0, 0), (0, _IN_PAD - _IN_RAW))).astype(jnp.bfloat16)

    h1 = jnp.dot(x, params["w1"], preferred_element_type=jnp.float32) + params["b1"]
    h1 = _leaky_relu(h1.astype(jnp.bfloat16)) if bf16_epi \
        else _leaky_relu(h1).astype(jnp.bfloat16)
    h2 = jnp.dot(h1, params["w2"], preferred_element_type=jnp.float32) + params["b2"]
    h2 = _leaky_relu(h2.astype(jnp.bfloat16)) if bf16_epi \
        else _leaky_relu(h2).astype(jnp.bfloat16)
    h3 = jnp.dot(h2, params["w3"], preferred_element_type=jnp.float32) + params["b3"]
    ref = jnp.tanh(h3).reshape(B, 1, 28, 28)

    assert jnp.allclose(img, ref, atol=2e-3, rtol=2e-3), (
        float(jnp.max(jnp.abs(img - ref))))

    print("KERNEL_OK")
</pallas_src>

<mosaic_0001>
module attributes {stable_mosaic.version = 11 : i64} {
  func.func @generator_mlp_kernel(%arg0: i32, %arg1: memref<16x128xf32, #tpu.memory_space<vmem>>, %arg2: memref<128x256xbf16, #tpu.memory_space<vmem>>, %arg3: memref<1x256xf32, #tpu.memory_space<vmem>>, %arg4: memref<256x512xbf16, #tpu.memory_space<vmem>>, %arg5: memref<1x512xf32, #tpu.memory_space<vmem>>, %arg6: memref<512x784xbf16, #tpu.memory_space<vmem>>, %arg7: memref<1x784xf32, #tpu.memory_space<vmem>>, %arg8: memref<16x784xf32, #tpu.memory_space<vmem>>) attributes {dimension_semantics = [#tpu.dimension_semantics<parallel>], iteration_bounds = array<i64: 1>, scalar_prefetch = 0 : i64, scratch_operands = 0 : i64, tpu.core_type = #tpu.core_type<tc>, window_params = [{transform_indices = @transform_0, window_bounds = array<i64: 16, 128>}, {pipeline_mode = #tpu.pipeline_mode<synchronous>, transform_indices = @transform_1, window_bounds = array<i64: 128, 256>}, {pipeline_mode = #tpu.pipeline_mode<synchronous>, transform_indices = @transform_2, window_bounds = array<i64: 1, 256>}, {pipeline_mode = #tpu.pipeline_mode<synchronous>, transform_indices = @transform_3, window_bounds = array<i64: 256, 512>}, {pipeline_mode = #tpu.pipeline_mode<synchronous>, transform_indices = @transform_4, window_bounds = array<i64: 1, 512>}, {pipeline_mode = #tpu.pipeline_mode<synchronous>, transform_indices = @transform_5, window_bounds = array<i64: 512, 784>}, {pipeline_mode = #tpu.pipeline_mode<synchronous>, transform_indices = @transform_6, window_bounds = array<i64: 1, 784>}, {transform_indices = @transform_7, window_bounds = array<i64: 16, 784>}]} {
    %c0 = arith.constant 0 : index
    %c0_0 = arith.constant 0 : index
    %0 = vector.load %arg1[%c0, %c0_0] : memref<16x128xf32, #tpu.memory_space<vmem>>, vector<16x128xf32>
    %1 = arith.truncf %0 : vector<16x128xf32> to vector<16x128xbf16>
    %c0_1 = arith.constant 0 : index
    %c0_2 = arith.constant 0 : index
    %2 = vector.load %arg2[%c0_1, %c0_2] : memref<128x256xbf16, #tpu.memory_space<vmem>>, vector<128x256xbf16>
    %cst = arith.constant dense<0.000000e+00> : vector<16x256xf32>
    %3 = tpu.matmul %1, %2, %cst {dimension_numbers = #tpu.dot_dimension_numbers<[1], [0], [0], [1], [0, 0, 1, 1], [], []>} : vector<16x128xbf16>, vector<128x256xbf16>, vector<16x256xf32> -> vector<16x256xf32>
    %c0_3 = arith.constant 0 : index
    %c0_4 = arith.constant 0 : index
    %4 = vector.load %arg3[%c0_3, %c0_4] : memref<1x256xf32, #tpu.memory_space<vmem>>, vector<1x256xf32>
    %5 = vector.broadcast %4 : vector<1x256xf32> to vector<16x256xf32>
    %6 = arith.addf %3, %5 : vector<16x256xf32>
    %7 = arith.truncf %6 : vector<16x256xf32> to vector<16x256xbf16>
    %cst_5 = arith.constant 0.000000e+00 : bf16
    %8 = vector.broadcast %cst_5 : bf16 to vector<16x256xbf16>
    %9 = arith.cmpf ogt, %7, %8 : vector<16x256xbf16>
    %cst_6 = arith.constant 2.001950e-01 : bf16
    %10 = vector.broadcast %cst_6 : bf16 to vector<16x256xbf16>
    %11 = arith.mulf %10, %7 : vector<16x256xbf16>
    %12 = arith.select %9, %7, %11 : vector<16x256xi1>, vector<16x256xbf16>
    %c0_7 = arith.constant 0 : index
    %c0_8 = arith.constant 0 : index
    %13 = vector.load %arg4[%c0_7, %c0_8] : memref<256x512xbf16, #tpu.memory_space<vmem>>, vector<256x512xbf16>
    %cst_9 = arith.constant dense<0.000000e+00> : vector<16x512xf32>
    %14 = tpu.matmul %12, %13, %cst_9 {dimension_numbers = #tpu.dot_dimension_numbers<[1], [0], [0], [1], [0, 0, 1, 1], [], []>} : vector<16x256xbf16>, vector<256x512xbf16>, vector<16x512xf32> -> vector<16x512xf32>
    %c0_10 = arith.constant 0 : index
    %c0_11 = arith.constant 0 : index
    %15 = vector.load %arg5[%c0_10, %c0_11] : memref<1x512xf32, #tpu.memory_space<vmem>>, vector<1x512xf32>
    %16 = vector.broadcast %15 : vector<1x512xf32> to vector<16x512xf32>
    %17 = arith.addf %14, %16 : vector<16x512xf32>
    %18 = arith.truncf %17 : vector<16x512xf32> to vector<16x512xbf16>
    %cst_12 = arith.constant 0.000000e+00 : bf16
    %19 = vector.broadcast %cst_12 : bf16 to vector<16x512xbf16>
    %20 = arith.cmpf ogt, %18, %19 : vector<16x512xbf16>
    %cst_13 = arith.constant 2.001950e-01 : bf16
    %21 = vector.broadcast %cst_13 : bf16 to vector<16x512xbf16>
    %22 = arith.mulf %21, %18 : vector<16x512xbf16>
    %23 = arith.select %20, %18, %22 : vector<16x512xi1>, vector<16x512xbf16>
    %c0_14 = arith.constant 0 : index
    %c0_15 = arith.constant 0 : index
    %24 = vector.load %arg6[%c0_14, %c0_15] : memref<512x784xbf16, #tpu.memory_space<vmem>>, vector<512x784xbf16>
    %cst_16 = arith.constant dense<0.000000e+00> : vector<16x784xf32>
    %25 = tpu.matmul %23, %24, %cst_16 {dimension_numbers = #tpu.dot_dimension_numbers<[1], [0], [0], [1], [0, 0, 1, 1], [], []>} : vector<16x512xbf16>, vector<512x784xbf16>, vector<16x784xf32> -> vector<16x784xf32>
    %c0_17 = arith.constant 0 : index
    %c0_18 = arith.constant 0 : index
    %26 = vector.load %arg7[%c0_17, %c0_18] : memref<1x784xf32, #tpu.memory_space<vmem>>, vector<1x784xf32>
    %27 = vector.broadcast %26 : vector<1x784xf32> to vector<16x784xf32>
    %28 = arith.addf %25, %27 : vector<16x784xf32>
    %29 = math.tanh %28 : vector<16x784xf32>
    %c0_19 = arith.constant 0 : index
    %c0_20 = arith.constant 0 : index
    %30 = vector.load %arg8[%c0_19, %c0_20] : memref<16x784xf32, #tpu.memory_space<vmem>>, vector<16x784xf32>
    tpu.vector_store %arg8[%c0_19, %c0_20], %29 {strides = array<i32>} : memref<16x784xf32, #tpu.memory_space<vmem>>, vector<16x784xf32>,
    return
  }
  func.func @transform_0(%arg0: i32) -> (i32, i32) {
    %c0_i32 = arith.constant 0 : i32
    %c0_i32_0 = arith.constant 0 : i32
    return %arg0, %c0_i32 : i32, i32
  }
  func.func @transform_1(%arg0: i32) -> (i32, i32) {
    %c0_i32 = arith.constant 0 : i32
    %c0_i32_0 = arith.constant 0 : i32
    %c0_i32_1 = arith.constant 0 : i32
    return %c0_i32, %c0_i32_0 : i32, i32
  }
  func.func @transform_2(%arg0: i32) -> (i32, i32) {
    %c0_i32 = arith.constant 0 : i32
    %c0_i32_0 = arith.constant 0 : i32
    %c0_i32_1 = arith.constant 0 : i32
    return %c0_i32, %c0_i32_0 : i32, i32
  }
  func.func @transform_3(%arg0: i32) -> (i32, i32) {
    %c0_i32 = arith.constant 0 : i32
    %c0_i32_0 = arith.constant 0 : i32
    %c0_i32_1 = arith.constant 0 : i32
    return %c0_i32, %c0_i32_0 : i32, i32
  }
  func.func @transform_4(%arg0: i32) -> (i32, i32) {
    %c0_i32 = arith.constant 0 : i32
    %c0_i32_0 = arith.constant 0 : i32
    %c0_i32_1 = arith.constant 0 : i32
    return %c0_i32, %c0_i32_0 : i32, i32
  }
  func.func @transform_5(%arg0: i32) -> (i32, i32) {
    %c0_i32 = arith.constant 0 : i32
    %c0_i32_0 = arith.constant 0 : i32
    %c0_i32_1 = arith.constant 0 : i32
    return %c0_i32, %c0_i32_0 : i32, i32
  }
  func.func @transform_6(%arg0: i32) -> (i32, i32) {
    %c0_i32 = arith.constant 0 : i32
    %c0_i32_0 = arith.constant 0 : i32
    %c0_i32_1 = arith.constant 0 : i32
    return %c0_i32, %c0_i32_0 : i32, i32
  }
  func.func @transform_7(%arg0: i32) -> (i32, i32) {
    %c0_i32 = arith.constant 0 : i32
    %c0_i32_0 = arith.constant 0 : i32
    return %arg0, %c0_i32 : i32, i32
  }
}

</mosaic_0001>

<bundles_post_ra>
// kernel: generator_forward.1
= control target key start
LH: loop header
LB: loop body
LE: loop exit
PB: predicated region body
PF: predicated region fallthrough
CT: control target
= control target key end

     0   :  { %v3357_v1 = vmov 0   ;;  %vm2503_vm6 = vcmask 130048   ;;  %s4432_s1 = inlined_call_operand.vmem [shape: bf16[128,256], index: 1, kind: input, shape index: {}]   ;;  %s4433_s3 = inlined_call_operand.vmem [shape: bf16[256,512], index: 3, kind: input, shape index: {}]   ;;  %s4434_s0 = inlined_call_operand.vmem [shape: f32[16,128], index: 0, kind: input, shape index: {}]   ;;  %s4435_s5 = inlined_call_operand.vmem [shape: bf16[512,784], index: 5, kind: input, shape index: {}]   ;;  %s4436_s2 = inlined_call_operand.vmem [shape: f32[1,256], index: 2, kind: input, shape index: {}]   ;;  %s4437_s4 = inlined_call_operand.vmem [shape: f32[1,512], index: 4, kind: input, shape index: {}]   ;;  %s4438_s6 = inlined_call_operand.vmem [shape: f32[1,784], index: 6, kind: input, shape index: {}]   ;;  %s4439_s7 = inlined_call_operand.vmem [shape: f32[16,784], index: 7, kind: output, shape index: {}]  }
   0x1   :  { %v2889_v0 = vld [vmem:[%s4432_s1 + $0x4] ss:$8 sps:$4 sm:$0xff]   ;;  %171 = vmatprep.mubr.bf16.mxu0 %v3357_v1  ;;  %v2891_v2 = vld [vmem:[%s4432_s1] ss:$8 sps:$4 sm:$0xff]   ;;  %v2892_v3 = vld [vmem:[%s4432_s1 + $0x14] ss:$8 sps:$4 sm:$0xff]  }
   0x2   :  { %139 = vmatprep.subr.bf16.mxu0 %v2889_v0  ;;  %v2894_v4 = vld [vmem:[%s4432_s1 + $0x10] ss:$8 sps:$4 sm:$0xff]   ;;  %v2895_v5 = vld [vmem:[%s4432_s1 + $0x24] ss:$8 sps:$4 sm:$0xff]   ;;  %v2897_v6 = vld [vmem:[%s4432_s1 + $0x20] ss:$8 sps:$4 sm:$0xff]  }
   0x3   :  { %140 = vmatpush1.bf16.msra.mxu0 %v2891_v2  ;;  %v2898_v7 = vld [vmem:[%s4432_s1 + $0x34] ss:$8 sps:$4 sm:$0xff]   ;;  %v2900_v8 = vld [vmem:[%s4432_s1 + $0x30] ss:$8 sps:$4 sm:$0xff]   ;;  %v2901_v9 = vld [vmem:[%s4432_s1 + $0x44] ss:$8 sps:$4 sm:$0xff]  }
   0x4   :  { %141 = vmatprep.subr.bf16.mxu0 %v2892_v3  ;;  %v2913_v10 = vld [vmem:[%s4433_s3 + $0x4] ss:$16 sps:$4 sm:$0xff]   ;;  %v2918_v11 = vld [vmem:[%s4433_s3] ss:$16 sps:$4 sm:$0xff]   ;;  %v29_v27 = vld [vmem:[%s4434_s0 + $0x8] sm:$0xff] }
   0x5   :  { %596 = vmatprep.subr.bf16.mxu1 %v2913_v10  ;;  %v2919_v12 = vld [vmem:[%s4433_s3 + $0x24] ss:$16 sps:$4 sm:$0xff]   ;;  %v2903_v13 = vld [vmem:[%s4432_s1 + $0x40] ss:$8 sps:$4 sm:$0xff]   ;;  %v2906_v17 = vld [vmem:[%s4432_s1 + $0x50] ss:$8 sps:$4 sm:$0xff]  }
   0x6   :  { %597 = vmatpush1.bf16.msra.mxu1 %v2918_v11  ;;  %v2904_v14 = vld [vmem:[%s4432_s1 + $0x54] ss:$8 sps:$4 sm:$0xff]   ;;  %v2924_v15 = vld [vmem:[%s4433_s3 + $0x20] ss:$16 sps:$4 sm:$0xff]   ;;  %v2907_v18 = vld [vmem:[%s4432_s1 + $0x64] ss:$8 sps:$4 sm:$0xff]  }
   0x7   :  { %142 = vmatpush1.bf16.msra.mxu0 %v2894_v4  ;;  %598 = vmatprep.subr.bf16.mxu1 %v2919_v12  ;;  %v2925_v16 = vld [vmem:[%s4433_s3 + $0x44] ss:$16 sps:$4 sm:$0xff]   ;;  %v2930_v19 = vld [vmem:[%s4433_s3 + $0x40] ss:$16 sps:$4 sm:$0xff]   ;;  %v2917_v28 = vld [vmem:[%s4433_s3 + $0xc] ss:$16 sps:$4 sm:$0xff]  }
   0x8   :  { %143 = vmatprep.subr.bf16.mxu0 %v2895_v5  ;;  %v2931_v20 = vld [vmem:[%s4433_s3 + $0x64] ss:$16 sps:$4 sm:$0xff]   ;;  %v2909_v21 = vld [vmem:[%s4432_s1 + $0x60] ss:$8 sps:$4 sm:$0xff]   ;;  %v2912_v25 = vld [vmem:[%s4432_s1 + $0x70] ss:$8 sps:$4 sm:$0xff]  }
   0x9   :  { %v2936_v22 = vld [vmem:[%s4433_s3 + $0x60] ss:$16 sps:$4 sm:$0xff]   ;;  %v2910_v23 = vld [vmem:[%s4432_s1 + $0x74] ss:$8 sps:$4 sm:$0xff]   ;;  %v2915_v32 = vld [vmem:[%s4433_s3 + $0x8] ss:$16 sps:$4 sm:$0xff]  }
   0xa   :  { %599 = vmatpush1.bf16.msra.mxu1 %v2924_v15  ;;  %v2937_v24 = vld [vmem:[%s4433_s3 + $0x84] ss:$16 sps:$4 sm:$0xff]   ;;  %v2942_v29 = vld [vmem:[%s4433_s3 + $0x80] ss:$16 sps:$4 sm:$0xff]   ;;  %v2923_v34 = vld [vmem:[%s4433_s3 + $0x2c] ss:$16 sps:$4 sm:$0xff]  }
   0xb   :  { %144 = vmatpush1.bf16.msra.mxu0 %v2897_v6  ;;  %600 = vmatprep.subr.bf16.mxu1 %v2925_v16  ;;  %v28_v26 = vld [vmem:[%s4434_s0] sm:$0xff]  ;;  %v2921_v36 = vld [vmem:[%s4433_s3 + $0x28] ss:$16 sps:$4 sm:$0xff]   ;;  %v2929_v37 = vld [vmem:[%s4433_s3 + $0x4c] ss:$16 sps:$4 sm:$0xff]  }
   0xc   :  { %145 = vmatprep.subr.bf16.mxu0 %v2898_v7  ;;  %v2943_v30 = vld [vmem:[%s4433_s3 + $0xa4] ss:$16 sps:$4 sm:$0xff]   ;;  %v30_v31 = vpack.c.bf16 %v29_v27, %v28_v26  ;;  %v2948_v33 = vld [vmem:[%s4433_s3 + $0xa0] ss:$16 sps:$4 sm:$0xff]   ;;  %v2927_v40 = vld [vmem:[%s4433_s3 + $0x48] ss:$16 sps:$4 sm:$0xff]  }
   0xd   :  { %v2949_v35 = vld [vmem:[%s4433_s3 + $0xc4] ss:$16 sps:$4 sm:$0xff]   ;;  %v2954_v38 = vld [vmem:[%s4433_s3 + $0xc0] ss:$16 sps:$4 sm:$0xff]   ;;  %v2935_v42 = vld [vmem:[%s4433_s3 + $0x6c] ss:$16 sps:$4 sm:$0xff]  }
   0xe   :  { %601 = vmatpush1.bf16.msra.mxu1 %v2930_v19  ;;  %v2955_v39 = vld [vmem:[%s4433_s3 + $0xe4] ss:$16 sps:$4 sm:$0xff]   ;;  %v2960_v41 = vld [vmem:[%s4433_s3 + $0xe0] ss:$16 sps:$4 sm:$0xff]   ;;  %v2933_v44 = vld [vmem:[%s4433_s3 + $0x68] ss:$16 sps:$4 sm:$0xff]  }
   0xf   :  { %146 = vmatpush1.bf16.msra.mxu0 %v2900_v8  ;;  %602 = vmatprep.subr.bf16.mxu1 %v2931_v20  ;;  %v2961_v43 = vld [vmem:[%s4433_s3 + $0x104] ss:$16 sps:$4 sm:$0xff]   ;;  %v2941_v45 = vld [vmem:[%s4433_s3 + $0x8c] ss:$16 sps:$4 sm:$0xff]   ;;  %v2966_v46 = vld [vmem:[%s4433_s3 + $0x100] ss:$16 sps:$4 sm:$0xff]  }
  0x10   :  { %147 = vmatprep.subr.bf16.mxu0 %v2901_v9  ;;  %v2967_v47 = vld [vmem:[%s4433_s3 + $0x124] ss:$16 sps:$4 sm:$0xff]   ;;  %v2939_v48 = vld [vmem:[%s4433_s3 + $0x88] ss:$16 sps:$4 sm:$0xff]   ;;  %v2972_v49 = vld [vmem:[%s4433_s3 + $0x120] ss:$16 sps:$4 sm:$0xff]  }
  0x11   :  { %v2947_v50 = vld [vmem:[%s4433_s3 + $0xac] ss:$16 sps:$4 sm:$0xff]   ;;  %v2973_v51 = vld [vmem:[%s4433_s3 + $0x144] ss:$16 sps:$4 sm:$0xff]   ;;  %v2945_v52 = vld [vmem:[%s4433_s3 + $0xa8] ss:$16 sps:$4 sm:$0xff]  }
  0x12   :  { %603 = vmatpush1.bf16.msra.mxu1 %v2936_v22  ;;  %v2978_v53 = vld [vmem:[%s4433_s3 + $0x140] ss:$16 sps:$4 sm:$0xff]   ;;  %v2953_v54 = vld [vmem:[%s4433_s3 + $0xcc] ss:$16 sps:$4 sm:$0xff]   ;;  %v2979_v55 = vld [vmem:[%s4433_s3 + $0x164] ss:$16 sps:$4 sm:$0xff]   ;;  %v49_v22 = vlaneseq }
  0x13   :  { %148 = vmatpush1.bf16.msra.mxu0 %v2903_v13  ;;  %604 = vmatprep.subr.bf16.mxu1 %v2937_v24  ;;  %v2951_v56 = vld [vmem:[%s4433_s3 + $0xc8] ss:$16 sps:$4 sm:$0xff]   ;;  %v2984_v57 = vld [vmem:[%s4433_s3 + $0x160] ss:$16 sps:$4 sm:$0xff]   ;;  %v2959_v58 = vld [vmem:[%s4433_s3 + $0xec] ss:$16 sps:$4 sm:$0xff]  }
  0x14   :  { %149 = vmatprep.subr.bf16.mxu0 %v2904_v14  ;;  %v2985_v59 = vld [vmem:[%s4433_s3 + $0x184] ss:$16 sps:$4 sm:$0xff]   ;;  %v2957_v60 = vld [vmem:[%s4433_s3 + $0xe8] ss:$16 sps:$4 sm:$0xff]   ;;  %v2990_v61 = vld [vmem:[%s4433_s3 + $0x180] ss:$16 sps:$4 sm:$0xff]  }
  0x15   :  { %v2965_v62 = vld [vmem:[%s4433_s3 + $0x10c] ss:$16 sps:$4 sm:$0xff]   ;;  %v2963_v63 = vld [vmem:[%s4433_s3 + $0x108] ss:$16 sps:$4 sm:$0xff]   ;;  %v2991_v8 = vld [vmem:[%s4433_s3 + $0x1a4] ss:$16 sps:$4 sm:$0xff]  }
  0x16   :  { %605 = vmatpush1.bf16.msra.mxu1 %v2942_v29  ;;  %v2971_v0 = vld [vmem:[%s4433_s3 + $0x12c] ss:$16 sps:$4 sm:$0xff]   ;;  %v2969_v1 = vld [vmem:[%s4433_s3 + $0x128] ss:$16 sps:$4 sm:$0xff]   ;;  %v2996_v11 = vld [vmem:[%s4433_s3 + $0x1a0] ss:$16 sps:$4 sm:$0xff]  }
  0x17   :  { %150 = vmatpush1.bf16.msra.mxu0 %v2906_v17  ;;  %606 = vmatprep.subr.bf16.mxu1 %v2943_v30  ;;  %v2977_v2 = vld [vmem:[%s4433_s3 + $0x14c] ss:$16 sps:$4 sm:$0xff]   ;;  %v2975_v3 = vld [vmem:[%s4433_s3 + $0x148] ss:$16 sps:$4 sm:$0xff]   ;;  %v2997_v12 = vld [vmem:[%s4433_s3 + $0x1c4] ss:$16 sps:$4 sm:$0xff]  }
  0x18   :  { %151 = vmatprep.subr.bf16.mxu0 %v2907_v18  ;;  %v2983_v4 = vld [vmem:[%s4433_s3 + $0x16c] ss:$16 sps:$4 sm:$0xff]   ;;  %v2981_v5 = vld [vmem:[%s4433_s3 + $0x168] ss:$16 sps:$4 sm:$0xff]   ;;  %v3002_v15 = vld [vmem:[%s4433_s3 + $0x1c0] ss:$16 sps:$4 sm:$0xff]  }
  0x19   :  { %v2989_v6 = vld [vmem:[%s4433_s3 + $0x18c] ss:$16 sps:$4 sm:$0xff]   ;;  %v2987_v7 = vld [vmem:[%s4433_s3 + $0x188] ss:$16 sps:$4 sm:$0xff]   ;;  %v3003_v16 = vld [vmem:[%s4433_s3 + $0x1e4] ss:$16 sps:$4 sm:$0xff]  }
  0x1a   :  { %607 = vmatpush1.bf16.msra.mxu1 %v2948_v33  ;;  %v2995_v9 = vld [vmem:[%s4433_s3 + $0x1ac] ss:$16 sps:$4 sm:$0xff]   ;;  %v2993_v10 = vld [vmem:[%s4433_s3 + $0x1a8] ss:$16 sps:$4 sm:$0xff]   ;;  %v3008_v19 = vld [vmem:[%s4433_s3 + $0x1e0] ss:$16 sps:$4 sm:$0xff]  }
  0x1b   :  { %152 = vmatpush1.bf16.msra.mxu0 %v2909_v21  ;;  %608 = vmatprep.subr.bf16.mxu1 %v2949_v35  ;;  %v3001_v13 = vld [vmem:[%s4433_s3 + $0x1cc] ss:$16 sps:$4 sm:$0xff]   ;;  %v2999_v14 = vld [vmem:[%s4433_s3 + $0x1c8] ss:$16 sps:$4 sm:$0xff]   ;;  %v3011_v20 = vld [vmem:[%s4435_s5 + $0x4] ss:$28 sps:$4 sm:$0xff]  }
  0x1c   :  { %153 = vmatprep.subr.bf16.mxu0 %v2910_v23  ;;  %v3005_v17 = vld [vmem:[%s4433_s3 + $0x1e8] ss:$16 sps:$4 sm:$0xff]   ;;  %v3007_v18 = vld [vmem:[%s4433_s3 + $0x1ec] ss:$16 sps:$4 sm:$0xff]   ;;  %v3650_v23 = vshrl.u32 %v49_v22, 7 }
  0x1d   :  { %v3014_v21 = vld [vmem:[%s4435_s5 + $0xc] ss:$28 sps:$4 sm:$0xff]   ;;  %v3080_v22 = vld [vmem:[%s4435_s5 + $0x274] ss:$28 sps:$4 sm:$0xff]  }
  0x1e   :  { %609 = vmatpush1.bf16.msra.mxu1 %v2954_v38  ;;  %v3653_v24 = vsub.s32 0, %v3650_v23  ;;  %v3659_v26 = vsub.s32 1, %v3650_v23 }
  0x1f   :  { %154 = vmatpush1.bf16.msra.mxu0 %v2912_v25  ;;  %610 = vmatprep.subr.bf16.mxu1 %v2955_v39  ;;  %v47_v25 = vld [vmem:[%s4436_s2] sm:$0x3] }
  0x20   :  { %639 = vmatprep.subr.bf16.mxu0 %v2917_v28  ;;  %v52_v27 = vrot.slane %v47_v25, %v3653_v24  ;;  %v56_v29 = vrot.slane %v47_v25, %v3659_v26  ;;  %v3075_v25 = vld [vmem:[%s4435_s5 + $0x268] ss:$28 sps:$4 sm:$0xff]  }
  0x22   :  { %172 = vmatmul.mubr.bf16.vlgmr.msra.gmra.mrb[0].mxu0 %v30_v31  ;;  %611 = vmatpush1.bf16.msra.mxu1 %v2960_v41  ;;  %v3009_v41 = vld [vmem:[%s4435_s5] ss:$28 sps:$4 sm:$0xff]  }
  0x23   :  { %640 = vmatpush1.bf16.msra.mxu0 %v2915_v32  ;;  %612 = vmatprep.subr.bf16.mxu1 %v2961_v43 }
  0x24   :  { %641 = vmatprep.subr.bf16.mxu0 %v2923_v34 }
  0x26   :  { %613 = vmatpush1.bf16.msra.mxu1 %v2966_v46 }
  0x27   :  { %642 = vmatpush1.bf16.msra.mxu0 %v2921_v36  ;;  %614 = vmatprep.subr.bf16.mxu1 %v2967_v47  ;;  %v3015_v47 = vld [vmem:[%s4435_s5 + $0x38] ss:$28 sps:$4 sm:$0xff]  }
  0x28   :  { %643 = vmatprep.subr.bf16.mxu0 %v2929_v37 }
  0x2a   :  { %615 = vmatpush1.bf16.msra.mxu1 %v2972_v49  ;;  %v3023_v49 = vld [vmem:[%s4435_s5 + $0x74] ss:$28 sps:$4 sm:$0xff]  }
  0x2b   :  { %644 = vmatpush1.bf16.msra.mxu0 %v2927_v40  ;;  %616 = vmatprep.subr.bf16.mxu1 %v2973_v51  ;;  %v3021_v51 = vld [vmem:[%s4435_s5 + $0x70] ss:$28 sps:$4 sm:$0xff]  }
  0x2c   :  { %645 = vmatprep.subr.bf16.mxu0 %v2935_v42  ;;  %v3012_v42 = vld [vmem:[%s4435_s5 + $0x8] ss:$28 sps:$4 sm:$0xff]  }
  0x2e   :  { %617 = vmatpush1.bf16.msra.mxu1 %v2978_v53  ;;  %v3029_v53 = vld [vmem:[%s4435_s5 + $0xac] ss:$28 sps:$4 sm:$0xff]  }
  0x2f   :  { %646 = vmatpush1.bf16.msra.mxu0 %v2933_v44  ;;  %618 = vmatprep.subr.bf16.mxu1 %v2979_v55  ;;  %v3017_v44 = vld [vmem:[%s4435_s5 + $0x3c] ss:$28 sps:$4 sm:$0xff]   ;;  %v3027_v55 = vld [vmem:[%s4435_s5 + $0xa8] ss:$28 sps:$4 sm:$0xff]  }
  0x30   :  { %647 = vmatprep.subr.bf16.mxu0 %v2941_v45  ;;  %v3020_v45 = vld [vmem:[%s4435_s5 + $0x44] ss:$28 sps:$4 sm:$0xff]  }
  0x32   :  { %619 = vmatpush1.bf16.msra.mxu1 %v2984_v57  ;;  %v3035_v57 = vld [vmem:[%s4435_s5 + $0xe4] ss:$28 sps:$4 sm:$0xff]  }
  0x33   :  { %648 = vmatpush1.bf16.msra.mxu0 %v2939_v48  ;;  %620 = vmatprep.subr.bf16.mxu1 %v2985_v59  ;;  %v3018_v48 = vld [vmem:[%s4435_s5 + $0x40] ss:$28 sps:$4 sm:$0xff]  }
  0x34   :  { %649 = vmatprep.subr.bf16.mxu0 %v2947_v50  ;;  %v3026_v50 = vld [vmem:[%s4435_s5 + $0x7c] ss:$28 sps:$4 sm:$0xff]  }
  0x35   :  { %v3033_v59 = vld [vmem:[%s4435_s5 + $0xe0] ss:$28 sps:$4 sm:$0xff]  }
  0x36   :  { %621 = vmatpush1.bf16.msra.mxu1 %v2990_v61  ;;  %v3041_v61 = vld [vmem:[%s4435_s5 + $0x11c] ss:$28 sps:$4 sm:$0xff]  }
  0x37   :  { %650 = vmatpush1.bf16.msra.mxu0 %v2945_v52  ;;  %622 = vmatprep.subr.bf16.mxu1 %v2991_v8  ;;  %v3024_v52 = vld [vmem:[%s4435_s5 + $0x78] ss:$28 sps:$4 sm:$0xff]   ;;  %v3054_v8 = vld [vmem:[%s4435_s5 + $0x190] ss:$28 sps:$4 sm:$0xff]  }
  0x38   :  { %651 = vmatprep.subr.bf16.mxu0 %v2953_v54  ;;  %v3032_v54 = vld [vmem:[%s4435_s5 + $0xb4] ss:$28 sps:$4 sm:$0xff]  }
  0x3a   :  { %623 = vmatpush1.bf16.msra.mxu1 %v2996_v11  ;;  %v3057_v11 = vld [vmem:[%s4435_s5 + $0x1c0] ss:$28 sps:$4 sm:$0xff]  }
  0x3b   :  { %652 = vmatpush1.bf16.msra.mxu0 %v2951_v56  ;;  %624 = vmatprep.subr.bf16.mxu1 %v2997_v12  ;;  %v3030_v56 = vld [vmem:[%s4435_s5 + $0xb0] ss:$28 sps:$4 sm:$0xff]   ;;  %v3060_v12 = vld [vmem:[%s4435_s5 + $0x1c8] ss:$28 sps:$4 sm:$0xff]  }
  0x3c   :  { %653 = vmatprep.subr.bf16.mxu0 %v2959_v58  ;;  %v3038_v58 = vld [vmem:[%s4435_s5 + $0xec] ss:$28 sps:$4 sm:$0xff]  }
  0x3e   :  { %625 = vmatpush1.bf16.msra.mxu1 %v3002_v15  ;;  %v3063_v15 = vld [vmem:[%s4435_s5 + $0x1f8] ss:$28 sps:$4 sm:$0xff]  }
  0x3f   :  { %654 = vmatpush1.bf16.msra.mxu0 %v2957_v60  ;;  %626 = vmatprep.subr.bf16.mxu1 %v3003_v16  ;;  %v3036_v60 = vld [vmem:[%s4435_s5 + $0xe8] ss:$28 sps:$4 sm:$0xff]   ;;  %v3066_v16 = vld [vmem:[%s4435_s5 + $0x200] ss:$28 sps:$4 sm:$0xff]  }
  0x40   :  { %655 = vmatprep.subr.bf16.mxu0 %v2965_v62  ;;  %v3044_v62 = vld [vmem:[%s4435_s5 + $0x124] ss:$28 sps:$4 sm:$0xff]  }
  0x42   :  { %627 = vmatpush1.bf16.msra.mxu1 %v3008_v19  ;;  %v3069_v19 = vld [vmem:[%s4435_s5 + $0x230] ss:$28 sps:$4 sm:$0xff]  }
  0x43   :  { %656 = vmatpush1.bf16.msra.mxu0 %v2963_v63  ;;  %2143 = vmatprep.subr.bf16.mxu1 %v3011_v20  ;;  %v3039_v63 = vld [vmem:[%s4435_s5 + $0x118] ss:$28 sps:$4 sm:$0xff]  }
  0x44   :  { %657 = vmatprep.subr.bf16.mxu0 %v2971_v0  ;;  %v3042_v0 = vld [vmem:[%s4435_s5 + $0x120] ss:$28 sps:$4 sm:$0xff]   ;;  %v3072_v20 = vld [vmem:[%s4435_s5 + $0x238] ss:$28 sps:$4 sm:$0xff]  }
  0x47   :  { %658 = vmatpush1.bf16.msra.mxu0 %v2969_v1  ;;  %v3047_v1 = vld [vmem:[%s4435_s5 + $0x154] ss:$28 sps:$4 sm:$0xff]  }
  0x48   :  { %659 = vmatprep.subr.bf16.mxu0 %v2977_v2  ;;  %v3050_v2 = vld [vmem:[%s4435_s5 + $0x15c] ss:$28 sps:$4 sm:$0xff]  }
  0x4b   :  { %660 = vmatpush1.bf16.msra.mxu0 %v2975_v3  ;;  %v3045_v3 = vld [vmem:[%s4435_s5 + $0x150] ss:$28 sps:$4 sm:$0xff]  }
  0x4c   :  { %661 = vmatprep.subr.bf16.mxu0 %v2983_v4  ;;  %v3048_v4 = vld [vmem:[%s4435_s5 + $0x158] ss:$28 sps:$4 sm:$0xff]  }
  0x4f   :  { %662 = vmatpush1.bf16.msra.mxu0 %v2981_v5  ;;  %v3053_v5 = vld [vmem:[%s4435_s5 + $0x18c] ss:$28 sps:$4 sm:$0xff]  }
  0x50   :  { %663 = vmatprep.subr.bf16.mxu0 %v2989_v6  ;;  %v3056_v6 = vld [vmem:[%s4435_s5 + $0x194] ss:$28 sps:$4 sm:$0xff]  }
  0x53   :  { %664 = vmatpush1.bf16.msra.mxu0 %v2987_v7  ;;  %v3051_v7 = vld [vmem:[%s4435_s5 + $0x188] ss:$28 sps:$4 sm:$0xff]  }
  0x54   :  { %665 = vmatprep.subr.bf16.mxu0 %v2995_v9  ;;  %v3059_v9 = vld [vmem:[%s4435_s5 + $0x1c4] ss:$28 sps:$4 sm:$0xff]  }
  0x57   :  { %666 = vmatpush1.bf16.msra.mxu0 %v2993_v10  ;;  %v3062_v10 = vld [vmem:[%s4435_s5 + $0x1cc] ss:$28 sps:$4 sm:$0xff]  }
  0x58   :  { %667 = vmatprep.subr.bf16.mxu0 %v3001_v13  ;;  %v3065_v13 = vld [vmem:[%s4435_s5 + $0x1fc] ss:$28 sps:$4 sm:$0xff]  }
  0x5b   :  { %668 = vmatpush1.bf16.msra.mxu0 %v2999_v14  ;;  %v3068_v14 = vld [vmem:[%s4435_s5 + $0x204] ss:$28 sps:$4 sm:$0xff]  }
  0x5c   :  { %669 = vmatprep.subr.bf16.mxu0 %v3007_v18  ;;  %v3074_v18 = vld [vmem:[%s4435_s5 + $0x23c] ss:$28 sps:$4 sm:$0xff]  }
  0x5f   :  { %670 = vmatpush1.bf16.msra.mxu0 %v3005_v17  ;;  %v3071_v17 = vld [vmem:[%s4435_s5 + $0x234] ss:$28 sps:$4 sm:$0xff]  }
  0x60   :  { %2229 = vmatprep.subr.bf16.mxu0 %v3014_v21  ;;  %v3077_v21 = vld [vmem:[%s4435_s5 + $0x26c] ss:$28 sps:$4 sm:$0xff]  }
  0xf5   :  { %v173_v28 = vpop.f32.mrb[0].mxu0 }
  0xf6   :  { %v175_v30 = vpop.f32.mrb[1].mxu0  ;;  %v174_v32 = vadd.f32 %v173_v28, %v52_v27  ;;  %v3083_v28 = vld [vmem:[%s4435_s5 + $0x2a4] ss:$28 sps:$4 sm:$0xff]  }
  0xf7   :  { %v177_v31 = vpop.f32.mrb[2].mxu0  ;;  %v176_v35 = vadd.f32 %v175_v30, %v56_v29  ;;  %v3081_v30 = vld [vmem:[%s4435_s5 + $0x2a0] ss:$28 sps:$4 sm:$0xff]  }
  0xf8   :  { %v178_v33 = vadd.f32 %v177_v31, %v52_v27  ;;  %v179_v34 = vpop.f32.mrb[3].mxu0  ;;  %v3078_v27 = vld [vmem:[%s4435_s5 + $0x270] ss:$28 sps:$4 sm:$0xff]   ;;  %v3084_v31 = vld [vmem:[%s4435_s5 + $0x2a8] ss:$28 sps:$4 sm:$0xff]  }
  0xf9   :  { %v180_v36 = vadd.f32 %v179_v34, %v56_v29  ;;  %v3086_v29 = vld [vmem:[%s4435_s5 + $0x2ac] ss:$28 sps:$4 sm:$0xff]   ;;  %v3087_v34 = vld [vmem:[%s4435_s5 + $0x2d8] ss:$28 sps:$4 sm:$0xff]  }
  0xfa   :  { %v182_v37 = vpack.c.bf16 %v178_v33, %v174_v32  ;;  %v3089_v32 = vld [vmem:[%s4435_s5 + $0x2dc] ss:$28 sps:$4 sm:$0xff]   ;;  %v3092_v33 = vld [vmem:[%s4435_s5 + $0x2e4] ss:$28 sps:$4 sm:$0xff]  }
  0xfb   :  { %v183_v38 = vpack.c.bf16 %v180_v36, %v176_v35  ;;  %v3090_v35 = vld [vmem:[%s4435_s5 + $0x2e0] ss:$28 sps:$4 sm:$0xff]   ;;  %v3095_v36 = vld [vmem:[%s4435_s5 + $0x314] ss:$28 sps:$4 sm:$0xff]  }
  0xfc   :  { %v186_v39 = vmul.bf16 1045249613, %v182_v37  ;;  %vm184_vm1 = vcmp.gt.bf16.partialorder %v182_v37, 0 }
  0xfd   :  { %vm185_vm0 = vcmp.gt.bf16.partialorder %v183_v38, 0  ;;  %v187_v40 = vmul.bf16 1045249613, %v183_v38 }
  0xfe   :  { %v188_v46 = vsel %vm184_vm1, %v182_v37, %v186_v39  ;;  %v3098_v37 = vld [vmem:[%s4435_s5 + $0x31c] ss:$28 sps:$4 sm:$0xff]  }
  0xff   :  { %v189_v43 = vsel %vm185_vm0, %v183_v38, %v187_v40  ;;  %v3093_v38 = vld [vmem:[%s4435_s5 + $0x310] ss:$28 sps:$4 sm:$0xff]   ;;  %v3096_v39 = vld [vmem:[%s4435_s5 + $0x318] ss:$28 sps:$4 sm:$0xff]  }
 0x100   :  { %628 = vmatprep.mubr.bf16.mxu1 %v189_v43  ;;  %671 = vmatprep.mubr.bf16.mxu0 %v189_v43  ;;  %v3101_v40 = vld [vmem:[%s4435_s5 + $0x34c] ss:$28 sps:$4 sm:$0xff]  }
 0x101   :  { %629 = vmatmul.mubr.bf16.vlgmr.msra.gmra.mrb[0].mxu1 %v188_v46  ;;  %672 = vmatmul.mubr.bf16.vlgmr.msra.gmra.mrb[4].mxu0 %v188_v46  ;;  %v3102_v43 = vld [vmem:[%s4435_s5 + $0x350] ss:$28 sps:$4 sm:$0xff]   ;;  %v266_v46 = vsub.s32 2, %v3650_v23 }
 0x102   :  { %2144 = vmatpush1.bf16.msra.mxu1 %v3009_v41  ;;  %2230 = vmatpush1.bf16.msra.mxu0 %v3012_v42  ;;  %v3104_v41 = vld [vmem:[%s4435_s5 + $0x354] ss:$28 sps:$4 sm:$0xff]   ;;  %v3099_v42 = vld [vmem:[%s4435_s5 + $0x348] ss:$28 sps:$4 sm:$0xff]  }
 0x103   :  { %2145 = vmatprep.subr.bf16.mxu1 %v3017_v44  ;;  %2231 = vmatprep.subr.bf16.mxu0 %v3020_v45  ;;  %v3107_v44 = vld [vmem:[%s4435_s5 + $0x384] ss:$28 sps:$4 sm:$0xff]   ;;  %v3110_v45 = vld [vmem:[%s4435_s5 + $0x38c] ss:$28 sps:$4 sm:$0xff]  }
 0x106   :  { %2146 = vmatpush1.bf16.msra.mxu1 %v3015_v47  ;;  %2232 = vmatpush1.bf16.msra.mxu0 %v3018_v48  ;;  %v254_v47 = vld [vmem:[%s4437_s4] sm:$0xf]  ;;  %v270_v48 = vsub.s32 3, %v3650_v23 }
 0x107   :  { %2147 = vmatprep.subr.bf16.mxu1 %v3023_v49  ;;  %2233 = vmatprep.subr.bf16.mxu0 %v3026_v50  ;;  %v259_v49 = vrot.slane %v254_v47, %v3653_v24  ;;  %v267_v50 = vrot.slane %v254_v47, %v266_v46 }
 0x10a   :  { %2148 = vmatpush1.bf16.msra.mxu1 %v3021_v51  ;;  %2234 = vmatpush1.bf16.msra.mxu0 %v3024_v52 }
 0x10b   :  { %2149 = vmatprep.subr.bf16.mxu1 %v3029_v53  ;;  %2235 = vmatprep.subr.bf16.mxu0 %v3032_v54  ;;  %v263_v53 = vrot.slane %v254_v47, %v3659_v26  ;;  %v271_v54 = vrot.slane %v254_v47, %v270_v48  ;;  %v3147_v47 = vld [vmem:[%s4435_s5 + $0x508] ss:$28 sps:$4 sm:$0xff]  }
 0x10e   :  { %2150 = vmatpush1.bf16.msra.mxu1 %v3027_v55  ;;  %2236 = vmatpush1.bf16.msra.mxu0 %v3030_v56 }
 0x10f   :  { %2151 = vmatprep.subr.bf16.mxu1 %v3035_v57  ;;  %2237 = vmatprep.subr.bf16.mxu0 %v3038_v58 }
 0x112   :  { %2152 = vmatpush1.bf16.msra.mxu1 %v3033_v59  ;;  %2238 = vmatpush1.bf16.msra.mxu0 %v3036_v60 }
 0x113   :  { %2153 = vmatprep.subr.bf16.mxu1 %v3041_v61  ;;  %2239 = vmatprep.subr.bf16.mxu0 %v3044_v62 }
 0x116   :  { %2154 = vmatpush1.bf16.msra.mxu1 %v3039_v63  ;;  %2240 = vmatpush1.bf16.msra.mxu0 %v3042_v0 }
 0x117   :  { %2155 = vmatprep.subr.bf16.mxu1 %v3047_v1  ;;  %2241 = vmatprep.subr.bf16.mxu0 %v3050_v2 }
 0x11a   :  { %2156 = vmatpush1.bf16.msra.mxu1 %v3045_v3  ;;  %2242 = vmatpush1.bf16.msra.mxu0 %v3048_v4 }
 0x11b   :  { %2157 = vmatprep.subr.bf16.mxu1 %v3053_v5  ;;  %2243 = vmatprep.subr.bf16.mxu0 %v3056_v6 }
 0x11e   :  { %2158 = vmatpush1.bf16.msra.mxu1 %v3051_v7  ;;  %2244 = vmatpush1.bf16.msra.mxu0 %v3054_v8 }
 0x11f   :  { %2159 = vmatprep.subr.bf16.mxu1 %v3059_v9  ;;  %2245 = vmatprep.subr.bf16.mxu0 %v3062_v10 }
 0x122   :  { %2160 = vmatpush1.bf16.msra.mxu1 %v3057_v11  ;;  %2246 = vmatpush1.bf16.msra.mxu0 %v3060_v12  ;;  %v3105_v12 = vld [vmem:[%s4435_s5 + $0x380] ss:$28 sps:$4 sm:$0xff]  }
 0x123   :  { %2161 = vmatprep.subr.bf16.mxu1 %v3065_v13  ;;  %2247 = vmatprep.subr.bf16.mxu0 %v3068_v14  ;;  %v3108_v13 = vld [vmem:[%s4435_s5 + $0x388] ss:$28 sps:$4 sm:$0xff]  }
 0x126   :  { %2162 = vmatpush1.bf16.msra.mxu1 %v3063_v15  ;;  %2248 = vmatpush1.bf16.msra.mxu0 %v3066_v16  ;;  %v3113_v16 = vld [vmem:[%s4435_s5 + $0x3bc] ss:$28 sps:$4 sm:$0xff]  }
 0x127   :  { %2163 = vmatprep.subr.bf16.mxu1 %v3071_v17  ;;  %2249 = vmatprep.subr.bf16.mxu0 %v3074_v18  ;;  %v3116_v17 = vld [vmem:[%s4435_s5 + $0x3c4] ss:$28 sps:$4 sm:$0xff]  }
 0x12a   :  { %2164 = vmatpush1.bf16.msra.mxu1 %v3069_v19  ;;  %2250 = vmatpush1.bf16.msra.mxu0 %v3072_v20  ;;  %v3111_v19 = vld [vmem:[%s4435_s5 + $0x3b8] ss:$28 sps:$4 sm:$0xff]   ;;  %v3114_v20 = vld [vmem:[%s4435_s5 + $0x3c0] ss:$28 sps:$4 sm:$0xff]  }
 0x12b   :  { %2165 = vmatprep.subr.bf16.mxu1 %v3077_v21  ;;  %2251 = vmatprep.subr.bf16.mxu0 %v3080_v22  ;;  %v3119_v21 = vld [vmem:[%s4435_s5 + $0x3f4] ss:$28 sps:$4 sm:$0xff]   ;;  %v3122_v22 = vld [vmem:[%s4435_s5 + $0x3fc] ss:$28 sps:$4 sm:$0xff]  }
 0x12e   :  { %2166 = vmatpush1.bf16.msra.mxu1 %v3075_v25  ;;  %2252 = vmatpush1.bf16.msra.mxu0 %v3078_v27  ;;  %v3117_v25 = vld [vmem:[%s4435_s5 + $0x3f0] ss:$28 sps:$4 sm:$0xff]   ;;  %v3120_v27 = vld [vmem:[%s4435_s5 + $0x3f8] ss:$28 sps:$4 sm:$0xff]  }
 0x12f   :  { %2167 = vmatprep.subr.bf16.mxu1 %v3083_v28  ;;  %2253 = vmatprep.subr.bf16.mxu0 %v3086_v29  ;;  %v3125_v28 = vld [vmem:[%s4435_s5 + $0x42c] ss:$28 sps:$4 sm:$0xff]   ;;  %v3128_v29 = vld [vmem:[%s4435_s5 + $0x434] ss:$28 sps:$4 sm:$0xff]  }
 0x132   :  { %2168 = vmatpush1.bf16.msra.mxu1 %v3081_v30  ;;  %2254 = vmatpush1.bf16.msra.mxu0 %v3084_v31  ;;  %v3123_v30 = vld [vmem:[%s4435_s5 + $0x428] ss:$28 sps:$4 sm:$0xff]   ;;  %v3126_v31 = vld [vmem:[%s4435_s5 + $0x430] ss:$28 sps:$4 sm:$0xff]  }
 0x133   :  { %2169 = vmatprep.subr.bf16.mxu1 %v3089_v32  ;;  %2255 = vmatprep.subr.bf16.mxu0 %v3092_v33  ;;  %v3131_v32 = vld [vmem:[%s4435_s5 + $0x464] ss:$28 sps:$4 sm:$0xff]   ;;  %v3134_v33 = vld [vmem:[%s4435_s5 + $0x46c] ss:$28 sps:$4 sm:$0xff]  }
 0x136   :  { %2170 = vmatpush1.bf16.msra.mxu1 %v3087_v34  ;;  %2256 = vmatpush1.bf16.msra.mxu0 %v3090_v35  ;;  %v3129_v34 = vld [vmem:[%s4435_s5 + $0x460] ss:$28 sps:$4 sm:$0xff]   ;;  %v3132_v35 = vld [vmem:[%s4435_s5 + $0x468] ss:$28 sps:$4 sm:$0xff]  }
 0x137   :  { %2171 = vmatprep.subr.bf16.mxu1 %v3095_v36  ;;  %2257 = vmatprep.subr.bf16.mxu0 %v3098_v37  ;;  %v3137_v36 = vld [vmem:[%s4435_s5 + $0x49c] ss:$28 sps:$4 sm:$0xff]   ;;  %v3140_v37 = vld [vmem:[%s4435_s5 + $0x4a4] ss:$28 sps:$4 sm:$0xff]  }
 0x13a   :  { %2172 = vmatpush1.bf16.msra.mxu1 %v3093_v38  ;;  %2258 = vmatpush1.bf16.msra.mxu0 %v3096_v39  ;;  %v3135_v38 = vld [vmem:[%s4435_s5 + $0x498] ss:$28 sps:$4 sm:$0xff]   ;;  %v3138_v39 = vld [vmem:[%s4435_s5 + $0x4a0] ss:$28 sps:$4 sm:$0xff]  }
 0x13b   :  { %2173 = vmatprep.subr.bf16.mxu1 %v3101_v40  ;;  %2259 = vmatprep.subr.bf16.mxu0 %v3104_v41  ;;  %v3143_v40 = vld [vmem:[%s4435_s5 + $0x4d4] ss:$28 sps:$4 sm:$0xff]   ;;  %v3146_v41 = vld [vmem:[%s4435_s5 + $0x4dc] ss:$28 sps:$4 sm:$0xff]  }
 0x13e   :  { %2174 = vmatpush1.bf16.msra.mxu1 %v3099_v42  ;;  %2260 = vmatpush1.bf16.msra.mxu0 %v3102_v43  ;;  %v3141_v42 = vld [vmem:[%s4435_s5 + $0x4d0] ss:$28 sps:$4 sm:$0xff]   ;;  %v3144_v43 = vld [vmem:[%s4435_s5 + $0x4d8] ss:$28 sps:$4 sm:$0xff]  }
 0x13f   :  { %2186 = vmatprep.subr.bf16.mxu1 %v3107_v44  ;;  %2272 = vmatprep.subr.bf16.mxu0 %v3110_v45  ;;  %v3149_v44 = vld [vmem:[%s4435_s5 + $0x50c] ss:$28 sps:$4 sm:$0xff]   ;;  %v3152_v45 = vld [vmem:[%s4435_s5 + $0x514] ss:$28 sps:$4 sm:$0xff]  }
 0x1d4   :  { %v630_v51 = vpop.f32.mrb[0].mxu1  ;;  %v673_v52 = vpop.f32.mrb[4].mxu0 }
 0x1d5   :  { %v632_v55 = vpop.f32.mrb[1].mxu1  ;;  %v675_v56 = vpop.f32.mrb[5].mxu0  ;;  %v631_v59 = vadd.f32 %v630_v51, %v259_v49  ;;  %v674_v60 = vadd.f32 %v673_v52, %v267_v50  ;;  %v3158_v51 = vld [vmem:[%s4435_s5 + $0x54c] ss:$28 sps:$4 sm:$0xff]   ;;  %v3153_v52 = vld [vmem:[%s4435_s5 + $0x540] ss:$28 sps:$4 sm:$0xff]  }
 0x1d6   :  { %v634_v57 = vpop.f32.mrb[2].mxu1  ;;  %v677_v58 = vpop.f32.mrb[6].mxu0  ;;  %v633_v1 = vadd.f32 %v632_v55, %v263_v53  ;;  %v676_v2 = vadd.f32 %v675_v56, %v271_v54  ;;  %v3164_v55 = vld [vmem:[%s4435_s5 + $0x584] ss:$28 sps:$4 sm:$0xff]   ;;  %v3159_v56 = vld [vmem:[%s4435_s5 + $0x578] ss:$28 sps:$4 sm:$0xff]  }
 0x1d7   :  { %v635_v61 = vadd.f32 %v634_v57, %v259_v49  ;;  %v678_v62 = vadd.f32 %v677_v58, %v267_v50  ;;  %v636_v63 = vpop.f32.mrb[3].mxu1  ;;  %v679_v0 = vpop.f32.mrb[7].mxu0  ;;  %v3150_v49 = vld [vmem:[%s4435_s5 + $0x510] ss:$28 sps:$4 sm:$0xff]   ;;  %v3155_v50 = vld [vmem:[%s4435_s5 + $0x544] ss:$28 sps:$4 sm:$0xff]  }
 0x1d8   :  { %v637_v3 = vadd.f32 %v636_v63, %v263_v53  ;;  %v680_v4 = vadd.f32 %v679_v0, %v271_v54  ;;  %v3156_v53 = vld [vmem:[%s4435_s5 + $0x548] ss:$28 sps:$4 sm:$0xff]   ;;  %v3161_v54 = vld [vmem:[%s4435_s5 + $0x57c] ss:$28 sps:$4 sm:$0xff]   ;;  %v3167_v58 = vld [vmem:[%s4435_s5 + $0x5b4] ss:$28 sps:$4 sm:$0xff]  }
 0x1d9   :  { %v682_v5 = vpack.c.bf16 %v635_v61, %v631_v59  ;;  %v3866_v6 = vpack.c.bf16 %v678_v62, %v674_v60  ;;  %v3162_v57 = vld [vmem:[%s4435_s5 + $0x580] ss:$28 sps:$4 sm:$0xff]   ;;  %v3165_v60 = vld [vmem:[%s4435_s5 + $0x5b0] ss:$28 sps:$4 sm:$0xff]   ;;  %v3168_v61 = vld [vmem:[%s4435_s5 + $0x5b8] ss:$28 sps:$4 sm:$0xff]  }
 0x1da   :  { %v683_v7 = vpack.c.bf16 %v637_v3, %v633_v1  ;;  %v685_v8 = vpack.c.bf16 %v680_v4, %v676_v2  ;;  %v3170_v59 = vld [vmem:[%s4435_s5 + $0x5bc] ss:$28 sps:$4 sm:$0xff]   ;;  %v3173_v62 = vld [vmem:[%s4435_s5 + $0x5ec] ss:$28 sps:$4 sm:$0xff]   ;;  %v3176_v63 = vld [vmem:[%s4435_s5 + $0x5f4] ss:$28 sps:$4 sm:$0xff]  }
 0x1db   :  { %v690_v9 = vmul.bf16 1045249613, %v682_v5  ;;  %vm686_vm3 = vcmp.gt.bf16.partialorder %v682_v5, 0  ;;  %v3171_v0 = vld [vmem:[%s4435_s5 + $0x5e8] ss:$28 sps:$4 sm:$0xff]   ;;  %vm688_vm5 = vcmp.gt.bf16.partialorder %v3866_v6, 0 }
 0x1dc   :  { %v691_v10 = vmul.bf16 1045249613, %v683_v7  ;;  %vm687_vm2 = vcmp.gt.bf16.partialorder %v683_v7, 0  ;;  %v693_v11 = vmul.bf16 1045249613, %v685_v8  ;;  %vm689_vm4 = vcmp.gt.bf16.partialorder %v685_v8, 0 }
 0x1dd   :  { %v3878_v15 = vsel %vm686_vm3, %v682_v5, %v690_v9  ;;  %v3174_v1 = vld [vmem:[%s4435_s5 + $0x5f0] ss:$28 sps:$4 sm:$0xff]   ;;  %v3179_v2 = vld [vmem:[%s4435_s5 + $0x624] ss:$28 sps:$4 sm:$0xff]   ;;  %v3183_v9 = vld [vmem:[%s4435_s5 + $0x658] ss:$28 sps:$4 sm:$0xff]  }
 0x1de   :  { %v3874_v14 = vsel %vm687_vm2, %v683_v7, %v691_v10  ;;  %v3888_v18 = vsel %vm689_vm4, %v685_v8, %v693_v11  ;;  %v3182_v3 = vld [vmem:[%s4435_s5 + $0x62c] ss:$28 sps:$4 sm:$0xff]   ;;  %v3177_v4 = vld [vmem:[%s4435_s5 + $0x620] ss:$28 sps:$4 sm:$0xff]   ;;  %v3191_v11 = vld [vmem:[%s4435_s5 + $0x694] ss:$28 sps:$4 sm:$0xff]  }
 0x1df   :  { %2175 = vmatprep.mubr.bf16.mxu1 %v3874_v14  ;;  %2261 = vmatprep.mubr.bf16.mxu0 %v3874_v14  ;;  %v3180_v5 = vld [vmem:[%s4435_s5 + $0x628] ss:$28 sps:$4 sm:$0xff]   ;;  %v3185_v7 = vld [vmem:[%s4435_s5 + $0x65c] ss:$28 sps:$4 sm:$0xff]  }
 0x1e0   :  { %2176 = vmatmul.mubr.bf16.vlgmr.msra.gmra.mrb[4].mxu1 %v3878_v15  ;;  %2262 = vmatmul.mubr.bf16.vlgmr.msra.gmra.mrb[8].mxu0 %v3878_v15  ;;  %v3188_v8 = vld [vmem:[%s4435_s5 + $0x664] ss:$28 sps:$4 sm:$0xff]  }
 0x1e1   :  { %2187 = vmatpush1.bf16.msra.mxu1 %v3105_v12  ;;  %2273 = vmatpush1.bf16.msra.mxu0 %v3108_v13  ;;  %v3186_v10 = vld [vmem:[%s4435_s5 + $0x660] ss:$28 sps:$4 sm:$0xff]   ;;  %v3189_v13 = vld [vmem:[%s4435_s5 + $0x690] ss:$28 sps:$4 sm:$0xff]  }
 0x1e2   :  { %2218 = vmatprep.mubr.bf16.mxu1 %v3888_v18  ;;  %2304 = vmatprep.mubr.bf16.mxu0 %v3888_v18  ;;  %v3194_v12 = vld [vmem:[%s4435_s5 + $0x69c] ss:$28 sps:$4 sm:$0xff]  }
 0x1e3   :  { %2188 = vmatprep.subr.bf16.mxu1 %v3113_v16  ;;  %2274 = vmatprep.subr.bf16.mxu0 %v3116_v17  ;;  %v3192_v16 = vld [vmem:[%s4435_s5 + $0x698] ss:$28 sps:$4 sm:$0xff]   ;;  %v3197_v17 = vld [vmem:[%s4435_s5 + $0x6cc] ss:$28 sps:$4 sm:$0xff]  }
 0x1e5   :  { %2189 = vmatpush1.bf16.msra.mxu1 %v3111_v19  ;;  %2275 = vmatpush1.bf16.msra.mxu0 %v3114_v20  ;;  %v3200_v19 = vld [vmem:[%s4435_s5 + $0x6d4] ss:$28 sps:$4 sm:$0xff]   ;;  %v3195_v20 = vld [vmem:[%s4435_s5 + $0x6c8] ss:$28 sps:$4 sm:$0xff]  }
 0x1e6   :  { %2190 = vmatprep.subr.bf16.mxu1 %v3119_v21  ;;  %2276 = vmatprep.subr.bf16.mxu0 %v3122_v22  ;;  %v3198_v21 = vld [vmem:[%s4435_s5 + $0x6d0] ss:$28 sps:$4 sm:$0xff]  }
 0x1e7   :  { %v3203_v22 = vld [vmem:[%s4435_s5 + $0x14] ss:$28 sps:$4 sm:$0xff]  }
 0x1e9   :  { %2191 = vmatpush1.bf16.msra.mxu1 %v3117_v25  ;;  %2277 = vmatpush1.bf16.msra.mxu0 %v3120_v27  ;;  %v3204_v25 = vld [vmem:[%s4435_s5 + $0x1d8] ss:$28 sps:$4 sm:$0xff]   ;;  %v692_v27 = vmul.bf16 1045249613, %v3866_v6 }
 0x1ea   :  { %2192 = vmatprep.subr.bf16.mxu1 %v3125_v28  ;;  %2278 = vmatprep.subr.bf16.mxu0 %v3128_v29  ;;  %v3201_v28 = vld [vmem:[%s4435_s5 + $0x10] ss:$28 sps:$4 sm:$0xff]   ;;  %v3205_v29 = vld [vmem:[%s4435_s5 + $0x18] ss:$28 sps:$4 sm:$0xff]  }
 0x1ed   :  { %2193 = vmatpush1.bf16.msra.mxu1 %v3123_v30  ;;  %2279 = vmatpush1.bf16.msra.mxu0 %v3126_v31  ;;  %v4081_v30 = vsel %vm688_vm5, %v3866_v6, %v692_v27  ;;  %v3208_v31 = vld [vmem:[%s4435_s5 + $0x4c] ss:$28 sps:$4 sm:$0xff]  }
 0x1ee   :  { %2194 = vmatprep.subr.bf16.mxu1 %v3131_v32  ;;  %2280 = vmatprep.subr.bf16.mxu0 %v3134_v33  ;;  %v3209_v32 = vld [vmem:[%s4435_s5 + $0x210] ss:$28 sps:$4 sm:$0xff]   ;;  %v3206_v6 = vld [vmem:[%s4435_s5 + $0x48] ss:$28 sps:$4 sm:$0xff]  }
 0x1ef   :  { %v3210_v33 = vld [vmem:[%s4435_s5 + $0x50] ss:$28 sps:$4 sm:$0xff]   ;;  %v3274_v27 = vld [vmem:[%s4435_s5 + $0x6a8] ss:$28 sps:$4 sm:$0xff]  }
 0x1f1   :  { %2195 = vmatpush1.bf16.msra.mxu1 %v3129_v34  ;;  %2281 = vmatpush1.bf16.msra.mxu0 %v3132_v35  ;;  %v3213_v34 = vld [vmem:[%s4435_s5 + $0x84] ss:$28 sps:$4 sm:$0xff]  }
 0x1f2   :  { %2196 = vmatprep.subr.bf16.mxu1 %v3137_v36  ;;  %2282 = vmatprep.subr.bf16.mxu0 %v3140_v37  ;;  %v3214_v35 = vld [vmem:[%s4435_s5 + $0x248] ss:$28 sps:$4 sm:$0xff]   ;;  %v3211_v36 = vld [vmem:[%s4435_s5 + $0x80] ss:$28 sps:$4 sm:$0xff]  }
 0x1f3   :  { %v3218_v37 = vld [vmem:[%s4435_s5 + $0xbc] ss:$28 sps:$4 sm:$0xff]  }
 0x1f5   :  { %2197 = vmatpush1.bf16.msra.mxu1 %v3135_v38  ;;  %2283 = vmatpush1.bf16.msra.mxu0 %v3138_v39  ;;  %v3219_v38 = vld [vmem:[%s4435_s5 + $0x280] ss:$28 sps:$4 sm:$0xff]   ;;  %v3216_v39 = vld [vmem:[%s4435_s5 + $0xb8] ss:$28 sps:$4 sm:$0xff]  }
 0x1f6   :  { %2198 = vmatprep.subr.bf16.mxu1 %v3143_v40  ;;  %2284 = vmatprep.subr.bf16.mxu0 %v3146_v41  ;;  %v3220_v40 = vld [vmem:[%s4435_s5 + $0xc0] ss:$28 sps:$4 sm:$0xff]   ;;  %v3223_v41 = vld [vmem:[%s4435_s5 + $0xf4] ss:$28 sps:$4 sm:$0xff]  }
 0x1f9   :  { %2199 = vmatpush1.bf16.msra.mxu1 %v3141_v42  ;;  %2285 = vmatpush1.bf16.msra.mxu0 %v3144_v43  ;;  %v3224_v42 = vld [vmem:[%s4435_s5 + $0x2b8] ss:$28 sps:$4 sm:$0xff]   ;;  %v3221_v43 = vld [vmem:[%s4435_s5 + $0xf0] ss:$28 sps:$4 sm:$0xff]  }
 0x1fa   :  { %2200 = vmatprep.subr.bf16.mxu1 %v3149_v44  ;;  %2286 = vmatprep.subr.bf16.mxu0 %v3152_v45  ;;  %v3225_v44 = vld [vmem:[%s4435_s5 + $0xf8] ss:$28 sps:$4 sm:$0xff]   ;;  %v3228_v45 = vld [vmem:[%s4435_s5 + $0x12c] ss:$28 sps:$4 sm:$0xff]  }
 0x1fd   :  { %2201 = vmatpush1.bf16.msra.mxu1 %v3147_v47  ;;  %2287 = vmatpush1.bf16.msra.mxu0 %v3150_v49  ;;  %v3229_v47 = vld [vmem:[%s4435_s5 + $0x2f0] ss:$28 sps:$4 sm:$0xff]   ;;  %v3226_v49 = vld [vmem:[%s4435_s5 + $0x128] ss:$28 sps:$4 sm:$0xff]  }
 0x1fe   :  { %2202 = vmatprep.subr.bf16.mxu1 %v3155_v50  ;;  %2288 = vmatprep.subr.bf16.mxu0 %v3158_v51  ;;  %v3230_v50 = vld [vmem:[%s4435_s5 + $0x130] ss:$28 sps:$4 sm:$0xff]   ;;  %v3233_v51 = vld [vmem:[%s4435_s5 + $0x164] ss:$28 sps:$4 sm:$0xff]  }
 0x201   :  { %2203 = vmatpush1.bf16.msra.mxu1 %v3153_v52  ;;  %2289 = vmatpush1.bf16.msra.mxu0 %v3156_v53  ;;  %v3234_v52 = vld [vmem:[%s4435_s5 + $0x328] ss:$28 sps:$4 sm:$0xff]   ;;  %v3231_v53 = vld [vmem:[%s4435_s5 + $0x160] ss:$28 sps:$4 sm:$0xff]  }
 0x202   :  { %2204 = vmatprep.subr.bf16.mxu1 %v3161_v54  ;;  %2290 = vmatprep.subr.bf16.mxu0 %v3164_v55  ;;  %v3235_v54 = vld [vmem:[%s4435_s5 + $0x168] ss:$28 sps:$4 sm:$0xff]   ;;  %v3238_v55 = vld [vmem:[%s4435_s5 + $0x19c] ss:$28 sps:$4 sm:$0xff]  }
 0x205   :  { %2205 = vmatpush1.bf16.msra.mxu1 %v3159_v56  ;;  %2291 = vmatpush1.bf16.msra.mxu0 %v3162_v57  ;;  %v3239_v56 = vld [vmem:[%s4435_s5 + $0x360] ss:$28 sps:$4 sm:$0xff]   ;;  %v3236_v57 = vld [vmem:[%s4435_s5 + $0x198] ss:$28 sps:$4 sm:$0xff]  }
 0x206   :  { %2206 = vmatprep.subr.bf16.mxu1 %v3167_v58  ;;  %2292 = vmatprep.subr.bf16.mxu0 %v3170_v59  ;;  %v3240_v58 = vld [vmem:[%s4435_s5 + $0x1a0] ss:$28 sps:$4 sm:$0xff]   ;;  %v3243_v59 = vld [vmem:[%s4435_s5 + $0x1d4] ss:$28 sps:$4 sm:$0xff]  }
 0x209   :  { %2207 = vmatpush1.bf16.msra.mxu1 %v3165_v60  ;;  %2293 = vmatpush1.bf16.msra.mxu0 %v3168_v61  ;;  %v3244_v60 = vld [vmem:[%s4435_s5 + $0x558] ss:$28 sps:$4 sm:$0xff]   ;;  %v3241_v61 = vld [vmem:[%s4435_s5 + $0x1d0] ss:$28 sps:$4 sm:$0xff]  }
 0x20a   :  { %2208 = vmatprep.subr.bf16.mxu1 %v3173_v62  ;;  %2294 = vmatprep.subr.bf16.mxu0 %v3176_v63  ;;  %v3245_v62 = vld [vmem:[%s4435_s5 + $0x398] ss:$28 sps:$4 sm:$0xff]   ;;  %v3248_v63 = vld [vmem:[%s4435_s5 + $0x20c] ss:$28 sps:$4 sm:$0xff]  }
 0x20d   :  { %2209 = vmatpush1.bf16.msra.mxu1 %v3171_v0  ;;  %2295 = vmatpush1.bf16.msra.mxu0 %v3174_v1  ;;  %v3249_v0 = vld [vmem:[%s4435_s5 + $0x590] ss:$28 sps:$4 sm:$0xff]   ;;  %v3246_v1 = vld [vmem:[%s4435_s5 + $0x208] ss:$28 sps:$4 sm:$0xff]  }
 0x20e   :  { %2210 = vmatprep.subr.bf16.mxu1 %v3179_v2  ;;  %2296 = vmatprep.subr.bf16.mxu0 %v3182_v3  ;;  %v3250_v2 = vld [vmem:[%s4435_s5 + $0x3d0] ss:$28 sps:$4 sm:$0xff]   ;;  %v3253_v3 = vld [vmem:[%s4435_s5 + $0x244] ss:$28 sps:$4 sm:$0xff]  }
 0x211   :  { %2211 = vmatpush1.bf16.msra.mxu1 %v3177_v4  ;;  %2297 = vmatpush1.bf16.msra.mxu0 %v3180_v5  ;;  %v3254_v4 = vld [vmem:[%s4435_s5 + $0x5c8] ss:$28 sps:$4 sm:$0xff]   ;;  %v3251_v5 = vld [vmem:[%s4435_s5 + $0x240] ss:$28 sps:$4 sm:$0xff]  }
 0x212   :  { %2212 = vmatprep.subr.bf16.mxu1 %v3185_v7  ;;  %2298 = vmatprep.subr.bf16.mxu0 %v3188_v8  ;;  %v3255_v7 = vld [vmem:[%s4435_s5 + $0x408] ss:$28 sps:$4 sm:$0xff]   ;;  %v3258_v8 = vld [vmem:[%s4435_s5 + $0x27c] ss:$28 sps:$4 sm:$0xff]  }
 0x215   :  { %2213 = vmatpush1.bf16.msra.mxu1 %v3183_v9  ;;  %2299 = vmatpush1.bf16.msra.mxu0 %v3186_v10  ;;  %v3259_v9 = vld [vmem:[%s4435_s5 + $0x600] ss:$28 sps:$4 sm:$0xff]   ;;  %v3256_v10 = vld [vmem:[%s4435_s5 + $0x278] ss:$28 sps:$4 sm:$0xff]  }
 0x216   :  { %2214 = vmatprep.subr.bf16.mxu1 %v3191_v11  ;;  %2300 = vmatprep.subr.bf16.mxu0 %v3194_v12  ;;  %v3260_v11 = vld [vmem:[%s4435_s5 + $0x440] ss:$28 sps:$4 sm:$0xff]   ;;  %v3263_v12 = vld [vmem:[%s4435_s5 + $0x2b4] ss:$28 sps:$4 sm:$0xff]  }
 0x219   :  { %2215 = vmatpush1.bf16.msra.mxu1 %v3189_v13  ;;  %2301 = vmatpush1.bf16.msra.mxu0 %v3192_v16  ;;  %v3264_v13 = vld [vmem:[%s4435_s5 + $0x638] ss:$28 sps:$4 sm:$0xff]   ;;  %v3261_v16 = vld [vmem:[%s4435_s5 + $0x2b0] ss:$28 sps:$4 sm:$0xff]  }
 0x21a   :  { %2216 = vmatprep.subr.bf16.mxu1 %v3197_v17  ;;  %2302 = vmatprep.subr.bf16.mxu0 %v3200_v19  ;;  %v3265_v17 = vld [vmem:[%s4435_s5 + $0x478] ss:$28 sps:$4 sm:$0xff]   ;;  %v3268_v19 = vld [vmem:[%s4435_s5 + $0x2ec] ss:$28 sps:$4 sm:$0xff]  }
 0x21d   :  { %2217 = vmatpush1.bf16.msra.mxu1 %v3195_v20  ;;  %2303 = vmatpush1.bf16.msra.mxu0 %v3198_v21  ;;  %v3269_v20 = vld [vmem:[%s4435_s5 + $0x670] ss:$28 sps:$4 sm:$0xff]   ;;  %v3266_v21 = vld [vmem:[%s4435_s5 + $0x2e8] ss:$28 sps:$4 sm:$0xff]  }
 0x21e   :  { %2315 = vmatprep.subr.bf16.mxu1 %v3203_v22  ;;  %2820 = vmatprep.subr.bf16.mxu0 %v3204_v25  ;;  %v3270_v22 = vld [vmem:[%s4435_s5 + $0x4b0] ss:$28 sps:$4 sm:$0xff]   ;;  %v3273_v25 = vld [vmem:[%s4435_s5 + $0x324] ss:$28 sps:$4 sm:$0xff]  }
 0x220   :  { %2219 = vmatmul.mubr.bf16.vlgmr.msra.gmra.mrb[4].mxu1 %v4081_v30  ;;  %2305 = vmatmul.mubr.bf16.vlgmr.msra.gmra.mrb[8].mxu0 %v4081_v30 }
 0x221   :  { %2316 = vmatpush1.bf16.msra.mxu1 %v3201_v28  ;;  %2347 = vmatprep.mubr.bf16.mxu1 %v3874_v14  ;;  %v3271_v28 = vld [vmem:[%s4435_s5 + $0x320] ss:$28 sps:$4 sm:$0xff]  }
 0x222   :  { %2821 = vmatpush3.bf16.msra.mxu0 %v3205_v29  ;;  %2433 = vmatprep.mubr.bf16.mxu0 %v3874_v14  ;;  %v3215_v14 = vld [vmem:[%s4435_s5 + $0x88] ss:$28 sps:$4 sm:$0xff]  }
 0x223   :  { %2317 = vmatprep.subr.bf16.mxu1 %v3208_v31  ;;  %2822 = vmatprep.subr.bf16.mxu0 %v3209_v32  ;;  %v3275_v29 = vld [vmem:[%s4435_s5 + $0x4e8] ss:$28 sps:$4 sm:$0xff]   ;;  %v3278_v31 = vld [vmem:[%s4435_s5 + $0x35c] ss:$28 sps:$4 sm:$0xff]  }
 0x224   :  { %v3279_v32 = vld [vmem:[%s4435_s5 + $0x6e0] ss:$28 sps:$4 sm:$0xff]  }
 0x225   :  { %2318 = vmatpush1.bf16.msra.mxu1 %v3206_v6  ;;  %v3276_v6 = vld [vmem:[%s4435_s5 + $0x358] ss:$28 sps:$4 sm:$0xff]  }
 0x226   :  { %2823 = vmatpush3.bf16.msra.mxu0 %v3210_v33  ;;  %2319 = vmatprep.subr.bf16.mxu1 %v3213_v34  ;;  %v3280_v33 = vld [vmem:[%s4435_s5 + $0x520] ss:$28 sps:$4 sm:$0xff]   ;;  %v3283_v34 = vld [vmem:[%s4435_s5 + $0x394] ss:$28 sps:$4 sm:$0xff]  }
 0x227   :  { %2824 = vmatprep.subr.bf16.mxu0 %v3214_v35  ;;  %v3281_v35 = vld [vmem:[%s4435_s5 + $0x390] ss:$28 sps:$4 sm:$0xff]  }
 0x229   :  { %2320 = vmatpush1.bf16.msra.mxu1 %v3211_v36  ;;  %v3286_v36 = vld [vmem:[%s4435_s5 + $0x3cc] ss:$28 sps:$4 sm:$0xff]  }
 0x22a   :  { %2825 = vmatpush3.bf16.msra.mxu0 %v3215_v14  ;;  %2321 = vmatprep.subr.bf16.mxu1 %v3218_v37  ;;  %v3284_v14 = vld [vmem:[%s4435_s5 + $0x3c8] ss:$28 sps:$4 sm:$0xff]  }
 0x22b   :  { %2826 = vmatprep.subr.bf16.mxu0 %v3219_v38  ;;  %v3289_v37 = vld [vmem:[%s4435_s5 + $0x404] ss:$28 sps:$4 sm:$0xff]  }
 0x22c   :  { %v3287_v38 = vld [vmem:[%s4435_s5 + $0x400] ss:$28 sps:$4 sm:$0xff]  }
 0x22d   :  { %2322 = vmatpush1.bf16.msra.mxu1 %v3216_v39  ;;  %v3295_v39 = vld [vmem:[%s4435_s5 + $0x474] ss:$28 sps:$4 sm:$0xff]  }
 0x22e   :  { %2827 = vmatpush3.bf16.msra.mxu0 %v3220_v40  ;;  %2323 = vmatprep.subr.bf16.mxu1 %v3223_v41  ;;  %v3293_v40 = vld [vmem:[%s4435_s5 + $0x470] ss:$28 sps:$4 sm:$0xff]  }
 0x22f   :  { %2828 = vmatprep.subr.bf16.mxu0 %v3224_v42  ;;  %v3298_v41 = vld [vmem:[%s4435_s5 + $0x4ac] ss:$28 sps:$4 sm:$0xff]  }
 0x230   :  { %v3296_v42 = vld [vmem:[%s4435_s5 + $0x4a8] ss:$28 sps:$4 sm:$0xff]  }
 0x231   :  { %2324 = vmatpush1.bf16.msra.mxu1 %v3221_v43  ;;  %v3301_v43 = vld [vmem:[%s4435_s5 + $0x4e4] ss:$28 sps:$4 sm:$0xff]  }
 0x232   :  { %2829 = vmatpush3.bf16.msra.mxu0 %v3225_v44  ;;  %2325 = vmatprep.subr.bf16.mxu1 %v3228_v45  ;;  %v3299_v44 = vld [vmem:[%s4435_s5 + $0x4e0] ss:$28 sps:$4 sm:$0xff]  }
 0x233   :  { %2830 = vmatprep.subr.bf16.mxu0 %v3229_v47  ;;  %v3304_v45 = vld [vmem:[%s4435_s5 + $0x51c] ss:$28 sps:$4 sm:$0xff]  }
 0x234   :  { %v3302_v47 = vld [vmem:[%s4435_s5 + $0x518] ss:$28 sps:$4 sm:$0xff]  }
 0x235   :  { %2326 = vmatpush1.bf16.msra.mxu1 %v3226_v49  ;;  %v3307_v49 = vld [vmem:[%s4435_s5 + $0x554] ss:$28 sps:$4 sm:$0xff]  }
 0x236   :  { %2831 = vmatpush3.bf16.msra.mxu0 %v3230_v50  ;;  %2327 = vmatprep.subr.bf16.mxu1 %v3233_v51  ;;  %v3305_v50 = vld [vmem:[%s4435_s5 + $0x550] ss:$28 sps:$4 sm:$0xff]  }
 0x237   :  { %2832 = vmatprep.subr.bf16.mxu0 %v3234_v52  ;;  %v3310_v51 = vld [vmem:[%s4435_s5 + $0x58c] ss:$28 sps:$4 sm:$0xff]  }
 0x238   :  { %v3308_v52 = vld [vmem:[%s4435_s5 + $0x588] ss:$28 sps:$4 sm:$0xff]  }
 0x239   :  { %2328 = vmatpush1.bf16.msra.mxu1 %v3231_v53  ;;  %v3313_v53 = vld [vmem:[%s4435_s5 + $0x5c4] ss:$28 sps:$4 sm:$0xff]  }
 0x23a   :  { %2833 = vmatpush3.bf16.msra.mxu0 %v3235_v54  ;;  %2329 = vmatprep.subr.bf16.mxu1 %v3238_v55  ;;  %v3311_v54 = vld [vmem:[%s4435_s5 + $0x5c0] ss:$28 sps:$4 sm:$0xff]  }
 0x23b   :  { %2834 = vmatprep.subr.bf16.mxu0 %v3239_v56  ;;  %v3316_v55 = vld [vmem:[%s4435_s5 + $0x5fc] ss:$28 sps:$4 sm:$0xff]  }
 0x23c   :  { %v3314_v56 = vld [vmem:[%s4435_s5 + $0x5f8] ss:$28 sps:$4 sm:$0xff]  }
 0x23d   :  { %2330 = vmatpush1.bf16.msra.mxu1 %v3236_v57  ;;  %v3319_v57 = vld [vmem:[%s4435_s5 + $0x634] ss:$28 sps:$4 sm:$0xff]  }
 0x23e   :  { %2835 = vmatpush3.bf16.msra.mxu0 %v3240_v58  ;;  %2331 = vmatprep.subr.bf16.mxu1 %v3243_v59  ;;  %v3317_v58 = vld [vmem:[%s4435_s5 + $0x630] ss:$28 sps:$4 sm:$0xff]  }
 0x23f   :  { %2842 = vmatprep.subr.bf16.mxu0 %v3244_v60  ;;  %v3322_v59 = vld [vmem:[%s4435_s5 + $0x66c] ss:$28 sps:$4 sm:$0xff]  }
 0x240   :  { %v3320_v60 = vld [vmem:[%s4435_s5 + $0x668] ss:$28 sps:$4 sm:$0xff]  }
 0x241   :  { %2434 = vmatmul.mubr.bf16.vlgmr.msra.gmra.mrb[12].mxu0 %v3878_v15  ;;  %2332 = vmatpush1.bf16.msra.mxu1 %v3241_v61  ;;  %v3325_v61 = vld [vmem:[%s4435_s5 + $0x6a4] ss:$28 sps:$4 sm:$0xff]  }
 0x242   :  { %2843 = vmatpush3.bf16.msra.mxu0 %v3245_v62  ;;  %2474 = vmatprep.mubr.bf16.mxu0 %v3888_v18  ;;  %v3323_v62 = vld [vmem:[%s4435_s5 + $0x6a0] ss:$28 sps:$4 sm:$0xff]  }
 0x243   :  { %2333 = vmatprep.subr.bf16.mxu1 %v3248_v63  ;;  %2844 = vmatprep.subr.bf16.mxu0 %v3249_v0  ;;  %v3328_v63 = vld [vmem:[%s4435_s5 + $0x6dc] ss:$28 sps:$4 sm:$0xff]  }
 0x244   :  { %v3326_v0 = vld [vmem:[%s4435_s5 + $0x6d8] ss:$28 sps:$4 sm:$0xff]  }
 0x245   :  { %2334 = vmatpush1.bf16.msra.mxu1 %v3246_v1  ;;  %v4372_v1 = vld [vmem:[%s4438_s6] sm:$0x7f] }
 0x246   :  { %2845 = vmatpush3.bf16.msra.mxu0 %v3250_v2  ;;  %2335 = vmatprep.subr.bf16.mxu1 %v3253_v3  ;;  %v959_v2 = vrot.slane %v4372_v1, %v3653_v24  ;;  %v967_v3 = vrot.slane %v4372_v1, %v266_v46 }
 0x247   :  { %2846 = vmatprep.subr.bf16.mxu0 %v3254_v4  ;;  %v963_v4 = vrot.slane %v4372_v1, %v3659_v26 }
 0x249   :  { %2336 = vmatpush1.bf16.msra.mxu1 %v3251_v5  ;;  %v971_v5 = vrot.slane %v4372_v1, %v270_v48 }
 0x24a   :  { %2847 = vmatpush3.bf16.msra.mxu0 %v3255_v7  ;;  %2337 = vmatprep.subr.bf16.mxu1 %v3258_v8 }
 0x24b   :  { %2848 = vmatprep.subr.bf16.mxu0 %v3259_v9 }
 0x24d   :  { %2338 = vmatpush1.bf16.msra.mxu1 %v3256_v10 }
 0x24e   :  { %2849 = vmatpush3.bf16.msra.mxu0 %v3260_v11  ;;  %2339 = vmatprep.subr.bf16.mxu1 %v3263_v12 }
 0x24f   :  { %2850 = vmatprep.subr.bf16.mxu0 %v3264_v13 }
 0x251   :  { %2340 = vmatpush1.bf16.msra.mxu1 %v3261_v16 }
 0x252   :  { %2851 = vmatpush3.bf16.msra.mxu0 %v3265_v17  ;;  %2341 = vmatprep.subr.bf16.mxu1 %v3268_v19 }
 0x253   :  { %2852 = vmatprep.subr.bf16.mxu0 %v3269_v20 }
 0x255   :  { %2342 = vmatpush1.bf16.msra.mxu1 %v3266_v21 }
 0x256   :  { %2853 = vmatpush3.bf16.msra.mxu0 %v3270_v22  ;;  %2343 = vmatprep.subr.bf16.mxu1 %v3273_v25 }
 0x257   :  { %2854 = vmatprep.subr.bf16.mxu0 %v3274_v27 }
 0x259   :  { %2344 = vmatpush1.bf16.msra.mxu1 %v3271_v28 }
 0x25a   :  { %2855 = vmatpush3.bf16.msra.mxu0 %v3275_v29  ;;  %2345 = vmatprep.subr.bf16.mxu1 %v3278_v31 }
 0x25b   :  { %2856 = vmatprep.subr.bf16.mxu0 %v3279_v32 }
 0x25d   :  { %2346 = vmatpush1.bf16.msra.mxu1 %v3276_v6 }
 0x25e   :  { %2857 = vmatpush3.bf16.msra.mxu0 %v3280_v33  ;;  %2358 = vmatprep.subr.bf16.mxu1 %v3283_v34 }
 0x260   :  { %2348 = vmatmul.mubr.bf16.vlgmr.msra.gmra.mrb[8].mxu1 %v3878_v15  ;;  %v3292_v15 = vld [vmem:[%s4435_s5 + $0x43c] ss:$28 sps:$4 sm:$0xff]  }
 0x261   :  { %2475 = vmatmul.mubr.bf16.vlgmr.msra.gmra.mrb[16].mxu0 %v4081_v30  ;;  %2359 = vmatpush1.bf16.msra.mxu1 %v3281_v35 }
 0x262   :  { %2390 = vmatprep.mubr.bf16.mxu1 %v3888_v18  ;;  %2360 = vmatprep.subr.bf16.mxu1 %v3286_v36  ;;  %v3290_v18 = vld [vmem:[%s4435_s5 + $0x438] ss:$28 sps:$4 sm:$0xff]  }
 0x265   :  { %2361 = vmatpush1.bf16.msra.mxu1 %v3284_v14 }
 0x266   :  { %2362 = vmatprep.subr.bf16.mxu1 %v3289_v37  ;;  %v982_v37 = vsub.s32 6, %v3650_v23 }
 0x269   :  { %2363 = vmatpush1.bf16.msra.mxu1 %v3287_v38  ;;  %v983_v38 = vrot.slane %v4372_v1, %v982_v37 }
 0x26a   :  { %2364 = vmatprep.subr.bf16.mxu1 %v3292_v15 }
 0x26d   :  { %2365 = vmatpush1.bf16.msra.mxu1 %v3290_v18 }
 0x26e   :  { %2366 = vmatprep.subr.bf16.mxu1 %v3295_v39 }
 0x271   :  { %2367 = vmatpush1.bf16.msra.mxu1 %v3293_v40 }
 0x272   :  { %2368 = vmatprep.subr.bf16.mxu1 %v3298_v41 }
 0x275   :  { %2369 = vmatpush1.bf16.msra.mxu1 %v3296_v42 }
 0x276   :  { %2370 = vmatprep.subr.bf16.mxu1 %v3301_v43 }
 0x279   :  { %2371 = vmatpush1.bf16.msra.mxu1 %v3299_v44 }
 0x27a   :  { %2372 = vmatprep.subr.bf16.mxu1 %v3304_v45 }
 0x27d   :  { %2373 = vmatpush1.bf16.msra.mxu1 %v3302_v47 }
 0x27e   :  { %2374 = vmatprep.subr.bf16.mxu1 %v3307_v49 }
 0x281   :  { %2375 = vmatpush1.bf16.msra.mxu1 %v3305_v50 }
 0x282   :  { %2376 = vmatprep.subr.bf16.mxu1 %v3310_v51  ;;  %v974_v51 = vsub.s32 4, %v3650_v23 }
 0x285   :  { %2377 = vmatpush1.bf16.msra.mxu1 %v3308_v52  ;;  %v978_v52 = vsub.s32 5, %v3650_v23 }
 0x286   :  { %2378 = vmatprep.subr.bf16.mxu1 %v3313_v53  ;;  %v975_v53 = vrot.slane %v4372_v1, %v974_v51 }
 0x289   :  { %2379 = vmatpush1.bf16.msra.mxu1 %v3311_v54  ;;  %v979_v54 = vrot.slane %v4372_v1, %v978_v52 }
 0x28a   :  { %2380 = vmatprep.subr.bf16.mxu1 %v3316_v55 }
 0x28d   :  { %2381 = vmatpush1.bf16.msra.mxu1 %v3314_v56 }
 0x28e   :  { %2382 = vmatprep.subr.bf16.mxu1 %v3319_v57 }
 0x291   :  { %2383 = vmatpush1.bf16.msra.mxu1 %v3317_v58 }
 0x292   :  { %2384 = vmatprep.subr.bf16.mxu1 %v3322_v59 }
 0x295   :  { %2385 = vmatpush1.bf16.msra.mxu1 %v3320_v60 }
 0x296   :  { %2386 = vmatprep.subr.bf16.mxu1 %v3325_v61 }
 0x299   :  { %2387 = vmatpush1.bf16.msra.mxu1 %v3323_v62 }
 0x29a   :  { %2388 = vmatprep.subr.bf16.mxu1 %v3328_v63 }
 0x29d   :  { %2389 = vmatpush1.bf16.msra.mxu1 %v3326_v0 }
 0x2a0   :  { %2391 = vmatmul.mubr.bf16.vlgmr.msra.gmra.mrb[8].mxu1 %v4081_v30 }
 0x2f3   :  { %v2220_v30 = vpop.f32.mrb[4].mxu1  ;;  %v2306_v7 = vpop.f32.mrb[8].mxu0 }
 0x2f4   :  { %v2864_v8 = vadd.f32 %v2220_v30, %v959_v2  ;;  %v2868_v9 = vadd.f32 %v2306_v7, %v967_v3  ;;  %v2222_v10 = vpop.f32.mrb[5].mxu1  ;;  %v2308_v11 = vpop.f32.mrb[9].mxu0 }
 0x2f5   :  { %v2865_v12 = vadd.f32 %v2222_v10, %v963_v4  ;;  %v2869_v13 = vadd.f32 %v2308_v11, %v971_v5  ;;  %v2224_v24 = vpop.f32.mrb[6].mxu1  ;;  %v2310_v16 = vpop.f32.mrb[10].mxu0 }
 0x2f6   :  { %3329 = vtanh.f32 %v2864_v8  ;;  %v2866_v17 = vadd.f32 %v2224_v24, %v959_v2  ;;  %v2226_v46 = vpop.f32.mrb[7].mxu1  ;;  %v2312_v19 = vpop.f32.mrb[11].mxu0  ;;  %v2870_v26 = vadd.f32 %v2310_v16, %v967_v3 }
 0x2f7   :  { %3331 = vtanh.f32 %v2868_v9  ;;  %v2867_v20 = vadd.f32 %v2226_v46, %v963_v4  ;;  %v2871_v48 = vadd.f32 %v2312_v19, %v971_v5 }
 0x2f8   :  { %3333 = vtanh.f32 %v2865_v12 }
 0x2f9   :  { %3335 = vtanh.f32 %v2869_v13 }
 0x2fa   :  { %3337 = vtanh.f32 %v2866_v17 }
 0x2fb   :  { %3339 = vtanh.f32 %v2870_v26 }
 0x2fc   :  { %3341 = vtanh.f32 %v2867_v20 }
 0x2fd   :  { %3343 = vtanh.f32 %v2871_v48 }
 0x300   :  { %v3330_v21 = vpop.eup %3329 }
 0x301   :  { %v3332_v22 = vpop.eup %3331  ;;  %2497 = vst [vmem:[%s4439_s7] sm:$0xff] %v3330_v21 }
 0x302   :  { %v3334_v25 = vpop.eup %3333  ;;  %2499 = vst [vmem:[%s4439_s7 + $0x10] sm:$0xff] %v3332_v22 }
 0x303   :  { %v3336_v27 = vpop.eup %3335  ;;  %2498 = vst [vmem:[%s4439_s7 + $0x8] sm:$0xff] %v3334_v25 }
 0x304   :  { %v3338_v28 = vpop.eup %3337  ;;  %2500 = vst [vmem:[%s4439_s7 + $0x18] sm:$0xff] %v3336_v27 }
 0x305   :  { %v3340_v29 = vpop.eup %3339  ;;  %2505 = vst [vmem:[%s4439_s7 + $0x38] sm:$0xff] %v3338_v28 }
 0x306   :  { %v3342_v31 = vpop.eup %3341  ;;  %2507 = vst [vmem:[%s4439_s7 + $0x48] sm:$0xff] %v3340_v29 }
 0x307   :  { %v3344_v32 = vpop.eup %3343  ;;  %2506 = vst [vmem:[%s4439_s7 + $0x40] sm:$0xff] %v3342_v31 }
 0x308   :  { %2508 = vst [vmem:[%s4439_s7 + $0x50] sm:$0xff] %v3344_v32 }
 0x314   :  { %v2836_v6 = vpop.f32.mrb[12].mxu0 }
 0x315   :  { %v2837_v33 = vpop.f32.mrb[13].mxu0 }
 0x316   :  { %v2838_v34 = vadd.f32 %v2837_v33, %v2836_v6  ;;  %v2839_v35 = vpop.f32.mrb[14].mxu0 }
 0x317   :  { %v2840_v36 = vpop.f32.mrb[15].mxu0 }
 0x318   :  { %v2841_v14 = vadd.f32 %v2840_v36, %v2839_v35  ;;  %v2436_v39 = vadd.f32 %v2838_v34, %v983_v38 }
 0x31a   :  { %v2439_v43 = vadd.f32 %v2841_v14, %v983_v38 }
 0x334   :  { %v2858_v15 = vpop.f32.mrb[16].mxu0 }
 0x335   :  { %v2859_v18 = vpop.f32.mrb[17].mxu0 }
 0x336   :  { %v2860_v40 = vadd.f32 %v2859_v18, %v2858_v15  ;;  %v2861_v41 = vpop.f32.mrb[18].mxu0 }
 0x337   :  { %v2862_v42 = vpop.f32.mrb[19].mxu0 }
 0x338   :  { %v2477_v44 = vadd.f32 %v2860_v40, %v2436_v39  ;;  %v2863_v45 = vadd.f32 %v2862_v42, %v2861_v41 }
 0x33a   :  { %3345 = vtanh.f32 %v2477_v44  ;;  %v2480_v47 = vadd.f32 %v2863_v45, %v2439_v43 }
 0x33c   :  { %3347 = vtanh.f32 %v2480_v47 }
 0x344   :  { %v3346_v49 = vpop.eup %3345 }
 0x345   :  { %2504 = vst.msk [vmem:[%s4439_s7 + $0x30] sm:$0xff] %vm2503_vm6, %v3346_v49 }
 0x346   :  { %v3348_v50 = vpop.eup %3347 }
 0x347   :  { %2511 = vst.msk [vmem:[%s4439_s7 + $0x68] sm:$0xff] %vm2503_vm6, %v3348_v50 }
 0x373   :  { %v2392_v55 = vpop.f32.mrb[8].mxu1 }
 0x374   :  { %v2872_v56 = vadd.f32 %v2392_v55, %v975_v53  ;;  %v2394_v57 = vpop.f32.mrb[9].mxu1 }
 0x375   :  { %v2873_v58 = vadd.f32 %v2394_v57, %v979_v54  ;;  %v2396_v59 = vpop.f32.mrb[10].mxu1 }
 0x376   :  { %3349 = vtanh.f32 %v2872_v56  ;;  %v2874_v60 = vadd.f32 %v2396_v59, %v975_v53  ;;  %v2398_v61 = vpop.f32.mrb[11].mxu1 }
 0x377   :  { %3351 = vtanh.f32 %v2873_v58  ;;  %v2875_v62 = vadd.f32 %v2398_v61, %v979_v54 }
 0x378   :  { %3353 = vtanh.f32 %v2874_v60 }
 0x379   :  { %3355 = vtanh.f32 %v2875_v62 }
 0x380   :  { %v3350_v63 = vpop.eup %3349 }
 0x381   :  { %v3352_v0 = vpop.eup %3351  ;;  %2501 = vst [vmem:[%s4439_s7 + $0x20] sm:$0xff] %v3350_v63 }
 0x382   :  { %v3354_v23 = vpop.eup %3353  ;;  %2502 = vst [vmem:[%s4439_s7 + $0x28] sm:$0xff] %v3352_v0 }
 0x383   :  { %v3356_v1 = vpop.eup %3355  ;;  %2509 = vst [vmem:[%s4439_s7 + $0x58] sm:$0xff] %v3354_v23 }
 0x384   :  { %2510 = vst [vmem:[%s4439_s7 + $0x60] sm:$0xff] %v3356_v1 }

</bundles_post_ra>
